<compile_context>
chip_gen: v7x
topology: tpu7x:2x2x1
jax: 0.10.0
libtpu: 0.0.40
codegen_flags: <defaults>
</compile_context>

<pallas_src>
import jax
import jax.numpy as jnp
from jax.experimental import pallas as pl
from jax.experimental.pallas import tpu as pltpu

LANES = 128


def _round_up(n, m):
    return ((n + m - 1) // m) * m


def _cdiv(a, b):
    return (a + b - 1) // b


def _leaky_relu(x, negative_slope=0.01):
    # == torch.nn.LeakyReLU(0.01); identical to where(x>=0, x, slope*x) for slope < 1
    return jnp.maximum(x, negative_slope * x)


def _dense_smem(w_ref, b_ref, h, out_f):
    """w_ref: SMEM (out_f*in_f,), row-major [out, in]; b_ref: SMEM (out_f,);
    h: list of in_f slabs, each (TBC, 128).  Returns list of out_f slabs."""
    in_f = len(h)
    outs = []
    for o in range(out_f):
        base = o * in_f
        terms = [w_ref[base + k] * h[k] for k in range(in_f)]
        # pairwise-tree reduction: shorter dependent add chain, fewer live vregs
        while len(terms) > 1:
            nxt = [terms[i] + terms[i + 1] for i in range(0, len(terms) - 1, 2)]
            if len(terms) % 2:
                nxt.append(terms[-1])
            terms = nxt
        outs.append(terms[0] + b_ref[o])
    return outs


def numnet_kernel(x_ref, w1_ref, b1_ref, w2_ref, b2_ref, w3_ref, b3_ref,
                  yhat_ref, logits_ref):
    x = [x_ref[k] for k in range(5)]                       # 5 x (TBC, 128) slabs

    h1 = [_leaky_relu(a) for a in _dense_smem(w1_ref, b1_ref, x, 10)]
    h2 = [_leaky_relu(a) for a in _dense_smem(w2_ref, b2_ref, h1, 5)]
    z = _dense_smem(w3_ref, b3_ref, h2, 3)                 # pre-sigmoid logits

    # logits output (sigmoid only needed here; argmax uses z directly)
    for o in range(3):
        logits_ref[o] = jax.nn.sigmoid(z[o])

    # argmax over the 3 classes, first-occurrence tie-breaking (torch semantics):
    # strictly-greater compares prefer the earlier index on ties.
    best01 = jnp.where(z[1] > z[0], jnp.int32(1), jnp.int32(0))
    yhat_ref[...] = jnp.where(z[2] > jnp.maximum(z[0], z[1]), jnp.int32(2), best01)


def _pick_tile(n_chunks, block_b):
    """Chunks (128-lane groups) per grid step, and padded total chunk count."""
    target = max(8, (_cdiv(block_b, LANES) // 8) * 8)
    if n_chunks <= 8:
        # single tile; block dims equal the full array dims (allowed even if < 8)
        return n_chunks, n_chunks
    # keep >= 2 grid steps (v7x: 2 TensorCores) and a multiple-of-8 chunk count
    tbc = min(target, _round_up(_cdiv(n_chunks, 2), 8))
    return tbc, _round_up(n_chunks, tbc)


def numnet_forward(x, params, block_b=16384):
    """x: [B, 5] float32. Returns (y_hat [B] int32, logits [B, 3] float32)."""
    w1, b1, w2, b2, w3, b3 = params            # stored as [in, out] / [1, out]
    B = x.shape[0]

    n_chunks = _cdiv(B, LANES)
    tbc, n_chunks_pad = _pick_tile(n_chunks, block_b)
    B_pad = n_chunks_pad * LANES
    grid = (n_chunks_pad // tbc,)

    # Feature-major slab layout: [5, n_chunks_pad, 128]; padded rows are zeros.
    # (Feature-major producers can hand this in directly and skip the transpose.)
    x_slabs = jnp.pad(x, ((0, B_pad - B), (0, 0))).T.reshape(5, n_chunks_pad, LANES)

    # Weights flattened row-major [out, in] / [out] for SMEM scalar reads.
    w1f, w2f, w3f = w1.T.reshape(-1), w2.T.reshape(-1), w3.T.reshape(-1)
    b1f, b2f, b3f = b1.reshape(-1), b2.reshape(-1), b3.reshape(-1)

    smem = pl.BlockSpec(memory_space=pltpu.MemorySpace.SMEM)

    yhat_slabs, logits_slabs = pl.pallas_call(
        numnet_kernel,
        out_shape=(
            jax.ShapeDtypeStruct((n_chunks_pad, LANES), jnp.int32),       # y_hat
            jax.ShapeDtypeStruct((3, n_chunks_pad, LANES), jnp.float32),  # logits
        ),
        grid=grid,
        in_specs=[
            pl.BlockSpec((5, tbc, LANES), lambda i: (0, i, 0)),  # x (pipelined)
            smem, smem, smem, smem, smem, smem,                  # weights/biases
        ],
        out_specs=(
            pl.BlockSpec((tbc, LANES), lambda i: (i, 0)),        # dense y_hat slab
            pl.BlockSpec((3, tbc, LANES), lambda i: (0, i, 0)),  # logits slabs
        ),
        compiler_params=pltpu.CompilerParams(
            dimension_semantics=("parallel",),                   # megacore-shardable
            vmem_limit_bytes=32 * 1024 * 1024,
        ),
        cost_estimate=pl.CostEstimate(
            flops=460 * B_pad,                # mul+add of all 3 layers + activations
            transcendentals=3 * B_pad,        # 3 sigmoids per row
            bytes_accessed=36 * B_pad + 532,  # 20B x + 12B logits + 4B yhat per row + weights
        ),
    )(x_slabs, w1f, b1f, w2f, b2f, w3f, b3f)

    y_hat = yhat_slabs.reshape(-1)[:B]
    logits = logits_slabs.reshape(3, B_pad)[:, :B].T
    return y_hat, logits


def xavier_uniform(key, fan_in, fan_out):
    # matches torch.nn.init.xavier_uniform_ (gain=1): U(-a, a), a = sqrt(6/(fan_in+fan_out))
    a = (6.0 / (fan_in + fan_out)) ** 0.5
    return jax.random.uniform(key, (fan_in, fan_out), jnp.float32, minval=-a, maxval=a)


def init_params(key):
    k1, k2, k3 = jax.random.split(key, 3)
    w1 = xavier_uniform(k1, 5, 10)
    b1 = jnp.zeros((1, 10), jnp.float32)
    w2 = xavier_uniform(k2, 10, 5)
    b2 = jnp.zeros((1, 5), jnp.float32)
    w3 = xavier_uniform(k3, 5, 3)
    b3 = jnp.zeros((1, 3), jnp.float32)
    return (w1, b1, w2, b2, w3, b3)


def _reference(x, params):
    w1, b1, w2, b2, w3, b3 = params
    a1 = x @ w1 + b1
    h1 = jnp.where(a1 >= 0, a1, 0.01 * a1)
    a2 = h1 @ w2 + b2
    h2 = jnp.where(a2 >= 0, a2, 0.01 * a2)
    logits = jax.nn.sigmoid(h2 @ w3 + b3)
    return jnp.argmax(logits, axis=1).astype(jnp.int32), logits


if __name__ == "__main__":
    key = jax.random.PRNGKey(0)
    kx, kx2, kp = jax.random.split(key, 3)
    params = init_params(kp)

    fwd = jax.jit(numnet_forward)

    # small primary check (single-tile path)
    B = 8
    x = jax.random.normal(kx, (B, 5), jnp.float32)
    y_hat, logits = fwd(x, params)
    jax.block_until_ready((y_hat, logits))
    ref_yhat, ref_logits = _reference(x, params)
    assert logits.shape == (B, 3) and y_hat.shape == (B,)
    assert jnp.allclose(logits, ref_logits, atol=1e-5), "logits mismatch (small batch)"
    assert jnp.array_equal(y_hat, ref_yhat), "argmax mismatch (small batch)"

    # secondary check exercising the multi-step grid + padding path
    B2 = 1157
    x2 = jax.random.normal(kx2, (B2, 5), jnp.float32)
    y_hat2, logits2 = fwd(x2, params)
    jax.block_until_ready((y_hat2, logits2))
    ref_yhat2, ref_logits2 = _reference(x2, params)
    assert jnp.allclose(logits2, ref_logits2, atol=1e-5), "logits mismatch (multi-tile)"
    assert jnp.array_equal(y_hat2, ref_yhat2), "argmax mismatch (multi-tile)"

    print("KERNEL_OK")
</pallas_src>

<mosaic_0001>
module attributes {stable_mosaic.version = 11 : i64} {
  func.func @numnet_kernel(%arg0: i32, %arg1: memref<5x1x128xf32, #tpu.memory_space<vmem>>, %arg2: memref<50xf32, #tpu.memory_space<smem>>, %arg3: memref<10xf32, #tpu.memory_space<smem>>, %arg4: memref<50xf32, #tpu.memory_space<smem>>, %arg5: memref<5xf32, #tpu.memory_space<smem>>, %arg6: memref<15xf32, #tpu.memory_space<smem>>, %arg7: memref<3xf32, #tpu.memory_space<smem>>, %arg8: memref<1x128xi32, #tpu.memory_space<vmem>>, %arg9: memref<3x1x128xf32, #tpu.memory_space<vmem>>) attributes {dimension_semantics = [#tpu.dimension_semantics<parallel>], iteration_bounds = array<i64: 1>, scalar_prefetch = 0 : i64, scratch_operands = 0 : i64, tpu.core_type = #tpu.core_type<tc>, window_params = [{transform_indices = @transform_0, window_bounds = array<i64: 5, 1, 128>}, {transform_indices = @transform_1, window_bounds = array<i64: 50>}, {transform_indices = @transform_2, window_bounds = array<i64: 10>}, {transform_indices = @transform_3, window_bounds = array<i64: 50>}, {transform_indices = @transform_4, window_bounds = array<i64: 5>}, {transform_indices = @transform_5, window_bounds = array<i64: 15>}, {transform_indices = @transform_6, window_bounds = array<i64: 3>}, {transform_indices = @transform_7, window_bounds = array<i64: 1, 128>}, {transform_indices = @transform_8, window_bounds = array<i64: 3, 1, 128>}]} {
    %c0 = arith.constant 0 : index
    %c0_0 = arith.constant 0 : index
    %c0_1 = arith.constant 0 : index
    %0 = vector.load %arg1[%c0, %c0_0, %c0_1] : memref<5x1x128xf32, #tpu.memory_space<vmem>>, vector<1x1x128xf32>
    %1 = vector.shape_cast %0 : vector<1x1x128xf32> to vector<1x128xf32>
    %c1 = arith.constant 1 : index
    %c0_2 = arith.constant 0 : index
    %c0_3 = arith.constant 0 : index
    %2 = vector.load %arg1[%c1, %c0_2, %c0_3] : memref<5x1x128xf32, #tpu.memory_space<vmem>>, vector<1x1x128xf32>
    %3 = vector.shape_cast %2 : vector<1x1x128xf32> to vector<1x128xf32>
    %c2 = arith.constant 2 : index
    %c0_4 = arith.constant 0 : index
    %c0_5 = arith.constant 0 : index
    %4 = vector.load %arg1[%c2, %c0_4, %c0_5] : memref<5x1x128xf32, #tpu.memory_space<vmem>>, vector<1x1x128xf32>
    %5 = vector.shape_cast %4 : vector<1x1x128xf32> to vector<1x128xf32>
    %c3 = arith.constant 3 : index
    %c0_6 = arith.constant 0 : index
    %c0_7 = arith.constant 0 : index
    %6 = vector.load %arg1[%c3, %c0_6, %c0_7] : memref<5x1x128xf32, #tpu.memory_space<vmem>>, vector<1x1x128xf32>
    %7 = vector.shape_cast %6 : vector<1x1x128xf32> to vector<1x128xf32>
    %c4 = arith.constant 4 : index
    %c0_8 = arith.constant 0 : index
    %c0_9 = arith.constant 0 : index
    %8 = vector.load %arg1[%c4, %c0_8, %c0_9] : memref<5x1x128xf32, #tpu.memory_space<vmem>>, vector<1x1x128xf32>
    %9 = vector.shape_cast %8 : vector<1x1x128xf32> to vector<1x128xf32>
    %c0_10 = arith.constant 0 : index
    %10 = memref.load %arg2[%c0_10] : memref<50xf32, #tpu.memory_space<smem>>
    %11 = vector.broadcast %10 : f32 to vector<1x128xf32>
    %12 = arith.mulf %11, %1 : vector<1x128xf32>
    %c1_11 = arith.constant 1 : index
    %13 = memref.load %arg2[%c1_11] : memref<50xf32, #tpu.memory_space<smem>>
    %14 = vector.broadcast %13 : f32 to vector<1x128xf32>
    %15 = arith.mulf %14, %3 : vector<1x128xf32>
    %c2_12 = arith.constant 2 : index
    %16 = memref.load %arg2[%c2_12] : memref<50xf32, #tpu.memory_space<smem>>
    %17 = vector.broadcast %16 : f32 to vector<1x128xf32>
    %18 = arith.mulf %17, %5 : vector<1x128xf32>
    %c3_13 = arith.constant 3 : index
    %19 = memref.load %arg2[%c3_13] : memref<50xf32, #tpu.memory_space<smem>>
    %20 = vector.broadcast %19 : f32 to vector<1x128xf32>
    %21 = arith.mulf %20, %7 : vector<1x128xf32>
    %c4_14 = arith.constant 4 : index
    %22 = memref.load %arg2[%c4_14] : memref<50xf32, #tpu.memory_space<smem>>
    %23 = vector.broadcast %22 : f32 to vector<1x128xf32>
    %24 = arith.mulf %23, %9 : vector<1x128xf32>
    %25 = arith.addf %12, %15 : vector<1x128xf32>
    %26 = arith.addf %18, %21 : vector<1x128xf32>
    %27 = arith.addf %25, %26 : vector<1x128xf32>
    %28 = arith.addf %27, %24 : vector<1x128xf32>
    %c0_15 = arith.constant 0 : index
    %29 = memref.load %arg3[%c0_15] : memref<10xf32, #tpu.memory_space<smem>>
    %30 = vector.broadcast %29 : f32 to vector<1x128xf32>
    %31 = arith.addf %28, %30 : vector<1x128xf32>
    %c5 = arith.constant 5 : index
    %32 = memref.load %arg2[%c5] : memref<50xf32, #tpu.memory_space<smem>>
    %33 = vector.broadcast %32 : f32 to vector<1x128xf32>
    %34 = arith.mulf %33, %1 : vector<1x128xf32>
    %c6 = arith.constant 6 : index
    %35 = memref.load %arg2[%c6] : memref<50xf32, #tpu.memory_space<smem>>
    %36 = vector.broadcast %35 : f32 to vector<1x128xf32>
    %37 = arith.mulf %36, %3 : vector<1x128xf32>
    %c7 = arith.constant 7 : index
    %38 = memref.load %arg2[%c7] : memref<50xf32, #tpu.memory_space<smem>>
    %39 = vector.broadcast %38 : f32 to vector<1x128xf32>
    %40 = arith.mulf %39, %5 : vector<1x128xf32>
    %c8 = arith.constant 8 : index
    %41 = memref.load %arg2[%c8] : memref<50xf32, #tpu.memory_space<smem>>
    %42 = vector.broadcast %41 : f32 to vector<1x128xf32>
    %43 = arith.mulf %42, %7 : vector<1x128xf32>
    %c9 = arith.constant 9 : index
    %44 = memref.load %arg2[%c9] : memref<50xf32, #tpu.memory_space<smem>>
    %45 = vector.broadcast %44 : f32 to vector<1x128xf32>
    %46 = arith.mulf %45, %9 : vector<1x128xf32>
    %47 = arith.addf %34, %37 : vector<1x128xf32>
    %48 = arith.addf %40, %43 : vector<1x128xf32>
    %49 = arith.addf %47, %48 : vector<1x128xf32>
    %50 = arith.addf %49, %46 : vector<1x128xf32>
    %c1_16 = arith.constant 1 : index
    %51 = memref.load %arg3[%c1_16] : memref<10xf32, #tpu.memory_space<smem>>
    %52 = vector.broadcast %51 : f32 to vector<1x128xf32>
    %53 = arith.addf %50, %52 : vector<1x128xf32>
    %c10 = arith.constant 10 : index
    %54 = memref.load %arg2[%c10] : memref<50xf32, #tpu.memory_space<smem>>
    %55 = vector.broadcast %54 : f32 to vector<1x128xf32>
    %56 = arith.mulf %55, %1 : vector<1x128xf32>
    %c11 = arith.constant 11 : index
    %57 = memref.load %arg2[%c11] : memref<50xf32, #tpu.memory_space<smem>>
    %58 = vector.broadcast %57 : f32 to vector<1x128xf32>
    %59 = arith.mulf %58, %3 : vector<1x128xf32>
    %c12 = arith.constant 12 : index
    %60 = memref.load %arg2[%c12] : memref<50xf32, #tpu.memory_space<smem>>
    %61 = vector.broadcast %60 : f32 to vector<1x128xf32>
    %62 = arith.mulf %61, %5 : vector<1x128xf32>
    %c13 = arith.constant 13 : index
    %63 = memref.load %arg2[%c13] : memref<50xf32, #tpu.memory_space<smem>>
    %64 = vector.broadcast %63 : f32 to vector<1x128xf32>
    %65 = arith.mulf %64, %7 : vector<1x128xf32>
    %c14 = arith.constant 14 : index
    %66 = memref.load %arg2[%c14] : memref<50xf32, #tpu.memory_space<smem>>
    %67 = vector.broadcast %66 : f32 to vector<1x128xf32>
    %68 = arith.mulf %67, %9 : vector<1x128xf32>
    %69 = arith.addf %56, %59 : vector<1x128xf32>
    %70 = arith.addf %62, %65 : vector<1x128xf32>
    %71 = arith.addf %69, %70 : vector<1x128xf32>
    %72 = arith.addf %71, %68 : vector<1x128xf32>
    %c2_17 = arith.constant 2 : index
    %73 = memref.load %arg3[%c2_17] : memref<10xf32, #tpu.memory_space<smem>>
    %74 = vector.broadcast %73 : f32 to vector<1x128xf32>
    %75 = arith.addf %72, %74 : vector<1x128xf32>
    %c15 = arith.constant 15 : index
    %76 = memref.load %arg2[%c15] : memref<50xf32, #tpu.memory_space<smem>>
    %77 = vector.broadcast %76 : f32 to vector<1x128xf32>
    %78 = arith.mulf %77, %1 : vector<1x128xf32>
    %c16 = arith.constant 16 : index
    %79 = memref.load %arg2[%c16] : memref<50xf32, #tpu.memory_space<smem>>
    %80 = vector.broadcast %79 : f32 to vector<1x128xf32>
    %81 = arith.mulf %80, %3 : vector<1x128xf32>
    %c17 = arith.constant 17 : index
    %82 = memref.load %arg2[%c17] : memref<50xf32, #tpu.memory_space<smem>>
    %83 = vector.broadcast %82 : f32 to vector<1x128xf32>
    %84 = arith.mulf %83, %5 : vector<1x128xf32>
    %c18 = arith.constant 18 : index
    %85 = memref.load %arg2[%c18] : memref<50xf32, #tpu.memory_space<smem>>
    %86 = vector.broadcast %85 : f32 to vector<1x128xf32>
    %87 = arith.mulf %86, %7 : vector<1x128xf32>
    %c19 = arith.constant 19 : index
    %88 = memref.load %arg2[%c19] : memref<50xf32, #tpu.memory_space<smem>>
    %89 = vector.broadcast %88 : f32 to vector<1x128xf32>
    %90 = arith.mulf %89, %9 : vector<1x128xf32>
    %91 = arith.addf %78, %81 : vector<1x128xf32>
    %92 = arith.addf %84, %87 : vector<1x128xf32>
    %93 = arith.addf %91, %92 : vector<1x128xf32>
    %94 = arith.addf %93, %90 : vector<1x128xf32>
    %c3_18 = arith.constant 3 : index
    %95 = memref.load %arg3[%c3_18] : memref<10xf32, #tpu.memory_space<smem>>
    %96 = vector.broadcast %95 : f32 to vector<1x128xf32>
    %97 = arith.addf %94, %96 : vector<1x128xf32>
    %c20 = arith.constant 20 : index
    %98 = memref.load %arg2[%c20] : memref<50xf32, #tpu.memory_space<smem>>
    %99 = vector.broadcast %98 : f32 to vector<1x128xf32>
    %100 = arith.mulf %99, %1 : vector<1x128xf32>
    %c21 = arith.constant 21 : index
    %101 = memref.load %arg2[%c21] : memref<50xf32, #tpu.memory_space<smem>>
    %102 = vector.broadcast %101 : f32 to vector<1x128xf32>
    %103 = arith.mulf %102, %3 : vector<1x128xf32>
    %c22 = arith.constant 22 : index
    %104 = memref.load %arg2[%c22] : memref<50xf32, #tpu.memory_space<smem>>
    %105 = vector.broadcast %104 : f32 to vector<1x128xf32>
    %106 = arith.mulf %105, %5 : vector<1x128xf32>
    %c23 = arith.constant 23 : index
    %107 = memref.load %arg2[%c23] : memref<50xf32, #tpu.memory_space<smem>>
    %108 = vector.broadcast %107 : f32 to vector<1x128xf32>
    %109 = arith.mulf %108, %7 : vector<1x128xf32>
    %c24 = arith.constant 24 : index
    %110 = memref.load %arg2[%c24] : memref<50xf32, #tpu.memory_space<smem>>
    %111 = vector.broadcast %110 : f32 to vector<1x128xf32>
    %112 = arith.mulf %111, %9 : vector<1x128xf32>
    %113 = arith.addf %100, %103 : vector<1x128xf32>
    %114 = arith.addf %106, %109 : vector<1x128xf32>
    %115 = arith.addf %113, %114 : vector<1x128xf32>
    %116 = arith.addf %115, %112 : vector<1x128xf32>
    %c4_19 = arith.constant 4 : index
    %117 = memref.load %arg3[%c4_19] : memref<10xf32, #tpu.memory_space<smem>>
    %118 = vector.broadcast %117 : f32 to vector<1x128xf32>
    %119 = arith.addf %116, %118 : vector<1x128xf32>
    %c25 = arith.constant 25 : index
    %120 = memref.load %arg2[%c25] : memref<50xf32, #tpu.memory_space<smem>>
    %121 = vector.broadcast %120 : f32 to vector<1x128xf32>
    %122 = arith.mulf %121, %1 : vector<1x128xf32>
    %c26 = arith.constant 26 : index
    %123 = memref.load %arg2[%c26] : memref<50xf32, #tpu.memory_space<smem>>
    %124 = vector.broadcast %123 : f32 to vector<1x128xf32>
    %125 = arith.mulf %124, %3 : vector<1x128xf32>
    %c27 = arith.constant 27 : index
    %126 = memref.load %arg2[%c27] : memref<50xf32, #tpu.memory_space<smem>>
    %127 = vector.broadcast %126 : f32 to vector<1x128xf32>
    %128 = arith.mulf %127, %5 : vector<1x128xf32>
    %c28 = arith.constant 28 : index
    %129 = memref.load %arg2[%c28] : memref<50xf32, #tpu.memory_space<smem>>
    %130 = vector.broadcast %129 : f32 to vector<1x128xf32>
    %131 = arith.mulf %130, %7 : vector<1x128xf32>
    %c29 = arith.constant 29 : index
    %132 = memref.load %arg2[%c29] : memref<50xf32, #tpu.memory_space<smem>>
    %133 = vector.broadcast %132 : f32 to vector<1x128xf32>
    %134 = arith.mulf %133, %9 : vector<1x128xf32>
    %135 = arith.addf %122, %125 : vector<1x128xf32>
    %136 = arith.addf %128, %131 : vector<1x128xf32>
    %137 = arith.addf %135, %136 : vector<1x128xf32>
    %138 = arith.addf %137, %134 : vector<1x128xf32>
    %c5_20 = arith.constant 5 : index
    %139 = memref.load %arg3[%c5_20] : memref<10xf32, #tpu.memory_space<smem>>
    %140 = vector.broadcast %139 : f32 to vector<1x128xf32>
    %141 = arith.addf %138, %140 : vector<1x128xf32>
    %c30 = arith.constant 30 : index
    %142 = memref.load %arg2[%c30] : memref<50xf32, #tpu.memory_space<smem>>
    %143 = vector.broadcast %142 : f32 to vector<1x128xf32>
    %144 = arith.mulf %143, %1 : vector<1x128xf32>
    %c31 = arith.constant 31 : index
    %145 = memref.load %arg2[%c31] : memref<50xf32, #tpu.memory_space<smem>>
    %146 = vector.broadcast %145 : f32 to vector<1x128xf32>
    %147 = arith.mulf %146, %3 : vector<1x128xf32>
    %c32 = arith.constant 32 : index
    %148 = memref.load %arg2[%c32] : memref<50xf32, #tpu.memory_space<smem>>
    %149 = vector.broadcast %148 : f32 to vector<1x128xf32>
    %150 = arith.mulf %149, %5 : vector<1x128xf32>
    %c33 = arith.constant 33 : index
    %151 = memref.load %arg2[%c33] : memref<50xf32, #tpu.memory_space<smem>>
    %152 = vector.broadcast %151 : f32 to vector<1x128xf32>
    %153 = arith.mulf %152, %7 : vector<1x128xf32>
    %c34 = arith.constant 34 : index
    %154 = memref.load %arg2[%c34] : memref<50xf32, #tpu.memory_space<smem>>
    %155 = vector.broadcast %154 : f32 to vector<1x128xf32>
    %156 = arith.mulf %155, %9 : vector<1x128xf32>
    %157 = arith.addf %144, %147 : vector<1x128xf32>
    %158 = arith.addf %150, %153 : vector<1x128xf32>
    %159 = arith.addf %157, %158 : vector<1x128xf32>
    %160 = arith.addf %159, %156 : vector<1x128xf32>
    %c6_21 = arith.constant 6 : index
    %161 = memref.load %arg3[%c6_21] : memref<10xf32, #tpu.memory_space<smem>>
    %162 = vector.broadcast %161 : f32 to vector<1x128xf32>
    %163 = arith.addf %160, %162 : vector<1x128xf32>
    %c35 = arith.constant 35 : index
    %164 = memref.load %arg2[%c35] : memref<50xf32, #tpu.memory_space<smem>>
    %165 = vector.broadcast %164 : f32 to vector<1x128xf32>
    %166 = arith.mulf %165, %1 : vector<1x128xf32>
    %c36 = arith.constant 36 : index
    %167 = memref.load %arg2[%c36] : memref<50xf32, #tpu.memory_space<smem>>
    %168 = vector.broadcast %167 : f32 to vector<1x128xf32>
    %169 = arith.mulf %168, %3 : vector<1x128xf32>
    %c37 = arith.constant 37 : index
    %170 = memref.load %arg2[%c37] : memref<50xf32, #tpu.memory_space<smem>>
    %171 = vector.broadcast %170 : f32 to vector<1x128xf32>
    %172 = arith.mulf %171, %5 : vector<1x128xf32>
    %c38 = arith.constant 38 : index
    %173 = memref.load %arg2[%c38] : memref<50xf32, #tpu.memory_space<smem>>
    %174 = vector.broadcast %173 : f32 to vector<1x128xf32>
    %175 = arith.mulf %174, %7 : vector<1x128xf32>
    %c39 = arith.constant 39 : index
    %176 = memref.load %arg2[%c39] : memref<50xf32, #tpu.memory_space<smem>>
    %177 = vector.broadcast %176 : f32 to vector<1x128xf32>
    %178 = arith.mulf %177, %9 : vector<1x128xf32>
    %179 = arith.addf %166, %169 : vector<1x128xf32>
    %180 = arith.addf %172, %175 : vector<1x128xf32>
    %181 = arith.addf %179, %180 : vector<1x128xf32>
    %182 = arith.addf %181, %178 : vector<1x128xf32>
    %c7_22 = arith.constant 7 : index
    %183 = memref.load %arg3[%c7_22] : memref<10xf32, #tpu.memory_space<smem>>
    %184 = vector.broadcast %183 : f32 to vector<1x128xf32>
    %185 = arith.addf %182, %184 : vector<1x128xf32>
    %c40 = arith.constant 40 : index
    %186 = memref.load %arg2[%c40] : memref<50xf32, #tpu.memory_space<smem>>
    %187 = vector.broadcast %186 : f32 to vector<1x128xf32>
    %188 = arith.mulf %187, %1 : vector<1x128xf32>
    %c41 = arith.constant 41 : index
    %189 = memref.load %arg2[%c41] : memref<50xf32, #tpu.memory_space<smem>>
    %190 = vector.broadcast %189 : f32 to vector<1x128xf32>
    %191 = arith.mulf %190, %3 : vector<1x128xf32>
    %c42 = arith.constant 42 : index
    %192 = memref.load %arg2[%c42] : memref<50xf32, #tpu.memory_space<smem>>
    %193 = vector.broadcast %192 : f32 to vector<1x128xf32>
    %194 = arith.mulf %193, %5 : vector<1x128xf32>
    %c43 = arith.constant 43 : index
    %195 = memref.load %arg2[%c43] : memref<50xf32, #tpu.memory_space<smem>>
    %196 = vector.broadcast %195 : f32 to vector<1x128xf32>
    %197 = arith.mulf %196, %7 : vector<1x128xf32>
    %c44 = arith.constant 44 : index
    %198 = memref.load %arg2[%c44] : memref<50xf32, #tpu.memory_space<smem>>
    %199 = vector.broadcast %198 : f32 to vector<1x128xf32>
    %200 = arith.mulf %199, %9 : vector<1x128xf32>
    %201 = arith.addf %188, %191 : vector<1x128xf32>
    %202 = arith.addf %194, %197 : vector<1x128xf32>
    %203 = arith.addf %201, %202 : vector<1x128xf32>
    %204 = arith.addf %203, %200 : vector<1x128xf32>
    %c8_23 = arith.constant 8 : index
    %205 = memref.load %arg3[%c8_23] : memref<10xf32, #tpu.memory_space<smem>>
    %206 = vector.broadcast %205 : f32 to vector<1x128xf32>
    %207 = arith.addf %204, %206 : vector<1x128xf32>
    %c45 = arith.constant 45 : index
    %208 = memref.load %arg2[%c45] : memref<50xf32, #tpu.memory_space<smem>>
    %209 = vector.broadcast %208 : f32 to vector<1x128xf32>
    %210 = arith.mulf %209, %1 : vector<1x128xf32>
    %c46 = arith.constant 46 : index
    %211 = memref.load %arg2[%c46] : memref<50xf32, #tpu.memory_space<smem>>
    %212 = vector.broadcast %211 : f32 to vector<1x128xf32>
    %213 = arith.mulf %212, %3 : vector<1x128xf32>
    %c47 = arith.constant 47 : index
    %214 = memref.load %arg2[%c47] : memref<50xf32, #tpu.memory_space<smem>>
    %215 = vector.broadcast %214 : f32 to vector<1x128xf32>
    %216 = arith.mulf %215, %5 : vector<1x128xf32>
    %c48 = arith.constant 48 : index
    %217 = memref.load %arg2[%c48] : memref<50xf32, #tpu.memory_space<smem>>
    %218 = vector.broadcast %217 : f32 to vector<1x128xf32>
    %219 = arith.mulf %218, %7 : vector<1x128xf32>
    %c49 = arith.constant 49 : index
    %220 = memref.load %arg2[%c49] : memref<50xf32, #tpu.memory_space<smem>>
    %221 = vector.broadcast %220 : f32 to vector<1x128xf32>
    %222 = arith.mulf %221, %9 : vector<1x128xf32>
    %223 = arith.addf %210, %213 : vector<1x128xf32>
    %224 = arith.addf %216, %219 : vector<1x128xf32>
    %225 = arith.addf %223, %224 : vector<1x128xf32>
    %226 = arith.addf %225, %222 : vector<1x128xf32>
    %c9_24 = arith.constant 9 : index
    %227 = memref.load %arg3[%c9_24] : memref<10xf32, #tpu.memory_space<smem>>
    %228 = vector.broadcast %227 : f32 to vector<1x128xf32>
    %229 = arith.addf %226, %228 : vector<1x128xf32>
    %cst = arith.constant 0.00999999977 : f32
    %230 = vector.broadcast %cst : f32 to vector<1x128xf32>
    %231 = arith.mulf %230, %31 : vector<1x128xf32>
    %232 = arith.maximumf %31, %231 : vector<1x128xf32>
    %cst_25 = arith.constant 0.00999999977 : f32
    %233 = vector.broadcast %cst_25 : f32 to vector<1x128xf32>
    %234 = arith.mulf %233, %53 : vector<1x128xf32>
    %235 = arith.maximumf %53, %234 : vector<1x128xf32>
    %cst_26 = arith.constant 0.00999999977 : f32
    %236 = vector.broadcast %cst_26 : f32 to vector<1x128xf32>
    %237 = arith.mulf %236, %75 : vector<1x128xf32>
    %238 = arith.maximumf %75, %237 : vector<1x128xf32>
    %cst_27 = arith.constant 0.00999999977 : f32
    %239 = vector.broadcast %cst_27 : f32 to vector<1x128xf32>
    %240 = arith.mulf %239, %97 : vector<1x128xf32>
    %241 = arith.maximumf %97, %240 : vector<1x128xf32>
    %cst_28 = arith.constant 0.00999999977 : f32
    %242 = vector.broadcast %cst_28 : f32 to vector<1x128xf32>
    %243 = arith.mulf %242, %119 : vector<1x128xf32>
    %244 = arith.maximumf %119, %243 : vector<1x128xf32>
    %cst_29 = arith.constant 0.00999999977 : f32
    %245 = vector.broadcast %cst_29 : f32 to vector<1x128xf32>
    %246 = arith.mulf %245, %141 : vector<1x128xf32>
    %247 = arith.maximumf %141, %246 : vector<1x128xf32>
    %cst_30 = arith.constant 0.00999999977 : f32
    %248 = vector.broadcast %cst_30 : f32 to vector<1x128xf32>
    %249 = arith.mulf %248, %163 : vector<1x128xf32>
    %250 = arith.maximumf %163, %249 : vector<1x128xf32>
    %cst_31 = arith.constant 0.00999999977 : f32
    %251 = vector.broadcast %cst_31 : f32 to vector<1x128xf32>
    %252 = arith.mulf %251, %185 : vector<1x128xf32>
    %253 = arith.maximumf %185, %252 : vector<1x128xf32>
    %cst_32 = arith.constant 0.00999999977 : f32
    %254 = vector.broadcast %cst_32 : f32 to vector<1x128xf32>
    %255 = arith.mulf %254, %207 : vector<1x128xf32>
    %256 = arith.maximumf %207, %255 : vector<1x128xf32>
    %cst_33 = arith.constant 0.00999999977 : f32
    %257 = vector.broadcast %cst_33 : f32 to vector<1x128xf32>
    %258 = arith.mulf %257, %229 : vector<1x128xf32>
    %259 = arith.maximumf %229, %258 : vector<1x128xf32>
    %c0_34 = arith.constant 0 : index
    %260 = memref.load %arg4[%c0_34] : memref<50xf32, #tpu.memory_space<smem>>
    %261 = vector.broadcast %260 : f32 to vector<1x128xf32>
    %262 = arith.mulf %261, %232 : vector<1x128xf32>
    %c1_35 = arith.constant 1 : index
    %263 = memref.load %arg4[%c1_35] : memref<50xf32, #tpu.memory_space<smem>>
    %264 = vector.broadcast %263 : f32 to vector<1x128xf32>
    %265 = arith.mulf %264, %235 : vector<1x128xf32>
    %c2_36 = arith.constant 2 : index
    %266 = memref.load %arg4[%c2_36] : memref<50xf32, #tpu.memory_space<smem>>
    %267 = vector.broadcast %266 : f32 to vector<1x128xf32>
    %268 = arith.mulf %267, %238 : vector<1x128xf32>
    %c3_37 = arith.constant 3 : index
    %269 = memref.load %arg4[%c3_37] : memref<50xf32, #tpu.memory_space<smem>>
    %270 = vector.broadcast %269 : f32 to vector<1x128xf32>
    %271 = arith.mulf %270, %241 : vector<1x128xf32>
    %c4_38 = arith.constant 4 : index
    %272 = memref.load %arg4[%c4_38] : memref<50xf32, #tpu.memory_space<smem>>
    %273 = vector.broadcast %272 : f32 to vector<1x128xf32>
    %274 = arith.mulf %273, %244 : vector<1x128xf32>
    %c5_39 = arith.constant 5 : index
    %275 = memref.load %arg4[%c5_39] : memref<50xf32, #tpu.memory_space<smem>>
    %276 = vector.broadcast %275 : f32 to vector<1x128xf32>
    %277 = arith.mulf %276, %247 : vector<1x128xf32>
    %c6_40 = arith.constant 6 : index
    %278 = memref.load %arg4[%c6_40] : memref<50xf32, #tpu.memory_space<smem>>
    %279 = vector.broadcast %278 : f32 to vector<1x128xf32>
    %280 = arith.mulf %279, %250 : vector<1x128xf32>
    %c7_41 = arith.constant 7 : index
    %281 = memref.load %arg4[%c7_41] : memref<50xf32, #tpu.memory_space<smem>>
    %282 = vector.broadcast %281 : f32 to vector<1x128xf32>
    %283 = arith.mulf %282, %253 : vector<1x128xf32>
    %c8_42 = arith.constant 8 : index
    %284 = memref.load %arg4[%c8_42] : memref<50xf32, #tpu.memory_space<smem>>
    %285 = vector.broadcast %284 : f32 to vector<1x128xf32>
    %286 = arith.mulf %285, %256 : vector<1x128xf32>
    %c9_43 = arith.constant 9 : index
    %287 = memref.load %arg4[%c9_43] : memref<50xf32, #tpu.memory_space<smem>>
    %288 = vector.broadcast %287 : f32 to vector<1x128xf32>
    %289 = arith.mulf %288, %259 : vector<1x128xf32>
    %290 = arith.addf %262, %265 : vector<1x128xf32>
    %291 = arith.addf %268, %271 : vector<1x128xf32>
    %292 = arith.addf %274, %277 : vector<1x128xf32>
    %293 = arith.addf %280, %283 : vector<1x128xf32>
    %294 = arith.addf %286, %289 : vector<1x128xf32>
    %295 = arith.addf %290, %291 : vector<1x128xf32>
    %296 = arith.addf %292, %293 : vector<1x128xf32>
    %297 = arith.addf %295, %296 : vector<1x128xf32>
    %298 = arith.addf %297, %294 : vector<1x128xf32>
    %c0_44 = arith.constant 0 : index
    %299 = memref.load %arg5[%c0_44] : memref<5xf32, #tpu.memory_space<smem>>
    %300 = vector.broadcast %299 : f32 to vector<1x128xf32>
    %301 = arith.addf %298, %300 : vector<1x128xf32>
    %c10_45 = arith.constant 10 : index
    %302 = memref.load %arg4[%c10_45] : memref<50xf32, #tpu.memory_space<smem>>
    %303 = vector.broadcast %302 : f32 to vector<1x128xf32>
    %304 = arith.mulf %303, %232 : vector<1x128xf32>
    %c11_46 = arith.constant 11 : index
    %305 = memref.load %arg4[%c11_46] : memref<50xf32, #tpu.memory_space<smem>>
    %306 = vector.broadcast %305 : f32 to vector<1x128xf32>
    %307 = arith.mulf %306, %235 : vector<1x128xf32>
    %c12_47 = arith.constant 12 : index
    %308 = memref.load %arg4[%c12_47] : memref<50xf32, #tpu.memory_space<smem>>
    %309 = vector.broadcast %308 : f32 to vector<1x128xf32>
    %310 = arith.mulf %309, %238 : vector<1x128xf32>
    %c13_48 = arith.constant 13 : index
    %311 = memref.load %arg4[%c13_48] : memref<50xf32, #tpu.memory_space<smem>>
    %312 = vector.broadcast %311 : f32 to vector<1x128xf32>
    %313 = arith.mulf %312, %241 : vector<1x128xf32>
    %c14_49 = arith.constant 14 : index
    %314 = memref.load %arg4[%c14_49] : memref<50xf32, #tpu.memory_space<smem>>
    %315 = vector.broadcast %314 : f32 to vector<1x128xf32>
    %316 = arith.mulf %315, %244 : vector<1x128xf32>
    %c15_50 = arith.constant 15 : index
    %317 = memref.load %arg4[%c15_50] : memref<50xf32, #tpu.memory_space<smem>>
    %318 = vector.broadcast %317 : f32 to vector<1x128xf32>
    %319 = arith.mulf %318, %247 : vector<1x128xf32>
    %c16_51 = arith.constant 16 : index
    %320 = memref.load %arg4[%c16_51] : memref<50xf32, #tpu.memory_space<smem>>
    %321 = vector.broadcast %320 : f32 to vector<1x128xf32>
    %322 = arith.mulf %321, %250 : vector<1x128xf32>
    %c17_52 = arith.constant 17 : index
    %323 = memref.load %arg4[%c17_52] : memref<50xf32, #tpu.memory_space<smem>>
    %324 = vector.broadcast %323 : f32 to vector<1x128xf32>
    %325 = arith.mulf %324, %253 : vector<1x128xf32>
    %c18_53 = arith.constant 18 : index
    %326 = memref.load %arg4[%c18_53] : memref<50xf32, #tpu.memory_space<smem>>
    %327 = vector.broadcast %326 : f32 to vector<1x128xf32>
    %328 = arith.mulf %327, %256 : vector<1x128xf32>
    %c19_54 = arith.constant 19 : index
    %329 = memref.load %arg4[%c19_54] : memref<50xf32, #tpu.memory_space<smem>>
    %330 = vector.broadcast %329 : f32 to vector<1x128xf32>
    %331 = arith.mulf %330, %259 : vector<1x128xf32>
    %332 = arith.addf %304, %307 : vector<1x128xf32>
    %333 = arith.addf %310, %313 : vector<1x128xf32>
    %334 = arith.addf %316, %319 : vector<1x128xf32>
    %335 = arith.addf %322, %325 : vector<1x128xf32>
    %336 = arith.addf %328, %331 : vector<1x128xf32>
    %337 = arith.addf %332, %333 : vector<1x128xf32>
    %338 = arith.addf %334, %335 : vector<1x128xf32>
    %339 = arith.addf %337, %338 : vector<1x128xf32>
    %340 = arith.addf %339, %336 : vector<1x128xf32>
    %c1_55 = arith.constant 1 : index
    %341 = memref.load %arg5[%c1_55] : memref<5xf32, #tpu.memory_space<smem>>
    %342 = vector.broadcast %341 : f32 to vector<1x128xf32>
    %343 = arith.addf %340, %342 : vector<1x128xf32>
    %c20_56 = arith.constant 20 : index
    %344 = memref.load %arg4[%c20_56] : memref<50xf32, #tpu.memory_space<smem>>
    %345 = vector.broadcast %344 : f32 to vector<1x128xf32>
    %346 = arith.mulf %345, %232 : vector<1x128xf32>
    %c21_57 = arith.constant 21 : index
    %347 = memref.load %arg4[%c21_57] : memref<50xf32, #tpu.memory_space<smem>>
    %348 = vector.broadcast %347 : f32 to vector<1x128xf32>
    %349 = arith.mulf %348, %235 : vector<1x128xf32>
    %c22_58 = arith.constant 22 : index
    %350 = memref.load %arg4[%c22_58] : memref<50xf32, #tpu.memory_space<smem>>
    %351 = vector.broadcast %350 : f32 to vector<1x128xf32>
    %352 = arith.mulf %351, %238 : vector<1x128xf32>
    %c23_59 = arith.constant 23 : index
    %353 = memref.load %arg4[%c23_59] : memref<50xf32, #tpu.memory_space<smem>>
    %354 = vector.broadcast %353 : f32 to vector<1x128xf32>
    %355 = arith.mulf %354, %241 : vector<1x128xf32>
    %c24_60 = arith.constant 24 : index
    %356 = memref.load %arg4[%c24_60] : memref<50xf32, #tpu.memory_space<smem>>
    %357 = vector.broadcast %356 : f32 to vector<1x128xf32>
    %358 = arith.mulf %357, %244 : vector<1x128xf32>
    %c25_61 = arith.constant 25 : index
    %359 = memref.load %arg4[%c25_61] : memref<50xf32, #tpu.memory_space<smem>>
    %360 = vector.broadcast %359 : f32 to vector<1x128xf32>
    %361 = arith.mulf %360, %247 : vector<1x128xf32>
    %c26_62 = arith.constant 26 : index
    %362 = memref.load %arg4[%c26_62] : memref<50xf32, #tpu.memory_space<smem>>
    %363 = vector.broadcast %362 : f32 to vector<1x128xf32>
    %364 = arith.mulf %363, %250 : vector<1x128xf32>
    %c27_63 = arith.constant 27 : index
    %365 = memref.load %arg4[%c27_63] : memref<50xf32, #tpu.memory_space<smem>>
    %366 = vector.broadcast %365 : f32 to vector<1x128xf32>
    %367 = arith.mulf %366, %253 : vector<1x128xf32>
    %c28_64 = arith.constant 28 : index
    %368 = memref.load %arg4[%c28_64] : memref<50xf32, #tpu.memory_space<smem>>
    %369 = vector.broadcast %368 : f32 to vector<1x128xf32>
    %370 = arith.mulf %369, %256 : vector<1x128xf32>
    %c29_65 = arith.constant 29 : index
    %371 = memref.load %arg4[%c29_65] : memref<50xf32, #tpu.memory_space<smem>>
    %372 = vector.broadcast %371 : f32 to vector<1x128xf32>
    %373 = arith.mulf %372, %259 : vector<1x128xf32>
    %374 = arith.addf %346, %349 : vector<1x128xf32>
    %375 = arith.addf %352, %355 : vector<1x128xf32>
    %376 = arith.addf %358, %361 : vector<1x128xf32>
    %377 = arith.addf %364, %367 : vector<1x128xf32>
    %378 = arith.addf %370, %373 : vector<1x128xf32>
    %379 = arith.addf %374, %375 : vector<1x128xf32>
    %380 = arith.addf %376, %377 : vector<1x128xf32>
    %381 = arith.addf %379, %380 : vector<1x128xf32>
    %382 = arith.addf %381, %378 : vector<1x128xf32>
    %c2_66 = arith.constant 2 : index
    %383 = memref.load %arg5[%c2_66] : memref<5xf32, #tpu.memory_space<smem>>
    %384 = vector.broadcast %383 : f32 to vector<1x128xf32>
    %385 = arith.addf %382, %384 : vector<1x128xf32>
    %c30_67 = arith.constant 30 : index
    %386 = memref.load %arg4[%c30_67] : memref<50xf32, #tpu.memory_space<smem>>
    %387 = vector.broadcast %386 : f32 to vector<1x128xf32>
    %388 = arith.mulf %387, %232 : vector<1x128xf32>
    %c31_68 = arith.constant 31 : index
    %389 = memref.load %arg4[%c31_68] : memref<50xf32, #tpu.memory_space<smem>>
    %390 = vector.broadcast %389 : f32 to vector<1x128xf32>
    %391 = arith.mulf %390, %235 : vector<1x128xf32>
    %c32_69 = arith.constant 32 : index
    %392 = memref.load %arg4[%c32_69] : memref<50xf32, #tpu.memory_space<smem>>
    %393 = vector.broadcast %392 : f32 to vector<1x128xf32>
    %394 = arith.mulf %393, %238 : vector<1x128xf32>
    %c33_70 = arith.constant 33 : index
    %395 = memref.load %arg4[%c33_70] : memref<50xf32, #tpu.memory_space<smem>>
    %396 = vector.broadcast %395 : f32 to vector<1x128xf32>
    %397 = arith.mulf %396, %241 : vector<1x128xf32>
    %c34_71 = arith.constant 34 : index
    %398 = memref.load %arg4[%c34_71] : memref<50xf32, #tpu.memory_space<smem>>
    %399 = vector.broadcast %398 : f32 to vector<1x128xf32>
    %400 = arith.mulf %399, %244 : vector<1x128xf32>
    %c35_72 = arith.constant 35 : index
    %401 = memref.load %arg4[%c35_72] : memref<50xf32, #tpu.memory_space<smem>>
    %402 = vector.broadcast %401 : f32 to vector<1x128xf32>
    %403 = arith.mulf %402, %247 : vector<1x128xf32>
    %c36_73 = arith.constant 36 : index
    %404 = memref.load %arg4[%c36_73] : memref<50xf32, #tpu.memory_space<smem>>
    %405 = vector.broadcast %404 : f32 to vector<1x128xf32>
    %406 = arith.mulf %405, %250 : vector<1x128xf32>
    %c37_74 = arith.constant 37 : index
    %407 = memref.load %arg4[%c37_74] : memref<50xf32, #tpu.memory_space<smem>>
    %408 = vector.broadcast %407 : f32 to vector<1x128xf32>
    %409 = arith.mulf %408, %253 : vector<1x128xf32>
    %c38_75 = arith.constant 38 : index
    %410 = memref.load %arg4[%c38_75] : memref<50xf32, #tpu.memory_space<smem>>
    %411 = vector.broadcast %410 : f32 to vector<1x128xf32>
    %412 = arith.mulf %411, %256 : vector<1x128xf32>
    %c39_76 = arith.constant 39 : index
    %413 = memref.load %arg4[%c39_76] : memref<50xf32, #tpu.memory_space<smem>>
    %414 = vector.broadcast %413 : f32 to vector<1x128xf32>
    %415 = arith.mulf %414, %259 : vector<1x128xf32>
    %416 = arith.addf %388, %391 : vector<1x128xf32>
    %417 = arith.addf %394, %397 : vector<1x128xf32>
    %418 = arith.addf %400, %403 : vector<1x128xf32>
    %419 = arith.addf %406, %409 : vector<1x128xf32>
    %420 = arith.addf %412, %415 : vector<1x128xf32>
    %421 = arith.addf %416, %417 : vector<1x128xf32>
    %422 = arith.addf %418, %419 : vector<1x128xf32>
    %423 = arith.addf %421, %422 : vector<1x128xf32>
    %424 = arith.addf %423, %420 : vector<1x128xf32>
    %c3_77 = arith.constant 3 : index
    %425 = memref.load %arg5[%c3_77] : memref<5xf32, #tpu.memory_space<smem>>
    %426 = vector.broadcast %425 : f32 to vector<1x128xf32>
    %427 = arith.addf %424, %426 : vector<1x128xf32>
    %c40_78 = arith.constant 40 : index
    %428 = memref.load %arg4[%c40_78] : memref<50xf32, #tpu.memory_space<smem>>
    %429 = vector.broadcast %428 : f32 to vector<1x128xf32>
    %430 = arith.mulf %429, %232 : vector<1x128xf32>
    %c41_79 = arith.constant 41 : index
    %431 = memref.load %arg4[%c41_79] : memref<50xf32, #tpu.memory_space<smem>>
    %432 = vector.broadcast %431 : f32 to vector<1x128xf32>
    %433 = arith.mulf %432, %235 : vector<1x128xf32>
    %c42_80 = arith.constant 42 : index
    %434 = memref.load %arg4[%c42_80] : memref<50xf32, #tpu.memory_space<smem>>
    %435 = vector.broadcast %434 : f32 to vector<1x128xf32>
    %436 = arith.mulf %435, %238 : vector<1x128xf32>
    %c43_81 = arith.constant 43 : index
    %437 = memref.load %arg4[%c43_81] : memref<50xf32, #tpu.memory_space<smem>>
    %438 = vector.broadcast %437 : f32 to vector<1x128xf32>
    %439 = arith.mulf %438, %241 : vector<1x128xf32>
    %c44_82 = arith.constant 44 : index
    %440 = memref.load %arg4[%c44_82] : memref<50xf32, #tpu.memory_space<smem>>
    %441 = vector.broadcast %440 : f32 to vector<1x128xf32>
    %442 = arith.mulf %441, %244 : vector<1x128xf32>
    %c45_83 = arith.constant 45 : index
    %443 = memref.load %arg4[%c45_83] : memref<50xf32, #tpu.memory_space<smem>>
    %444 = vector.broadcast %443 : f32 to vector<1x128xf32>
    %445 = arith.mulf %444, %247 : vector<1x128xf32>
    %c46_84 = arith.constant 46 : index
    %446 = memref.load %arg4[%c46_84] : memref<50xf32, #tpu.memory_space<smem>>
    %447 = vector.broadcast %446 : f32 to vector<1x128xf32>
    %448 = arith.mulf %447, %250 : vector<1x128xf32>
    %c47_85 = arith.constant 47 : index
    %449 = memref.load %arg4[%c47_85] : memref<50xf32, #tpu.memory_space<smem>>
    %450 = vector.broadcast %449 : f32 to vector<1x128xf32>
    %451 = arith.mulf %450, %253 : vector<1x128xf32>
    %c48_86 = arith.constant 48 : index
    %452 = memref.load %arg4[%c48_86] : memref<50xf32, #tpu.memory_space<smem>>
    %453 = vector.broadcast %452 : f32 to vector<1x128xf32>
    %454 = arith.mulf %453, %256 : vector<1x128xf32>
    %c49_87 = arith.constant 49 : index
    %455 = memref.load %arg4[%c49_87] : memref<50xf32, #tpu.memory_space<smem>>
    %456 = vector.broadcast %455 : f32 to vector<1x128xf32>
    %457 = arith.mulf %456, %259 : vector<1x128xf32>
    %458 = arith.addf %430, %433 : vector<1x128xf32>
    %459 = arith.addf %436, %439 : vector<1x128xf32>
    %460 = arith.addf %442, %445 : vector<1x128xf32>
    %461 = arith.addf %448, %451 : vector<1x128xf32>
    %462 = arith.addf %454, %457 : vector<1x128xf32>
    %463 = arith.addf %458, %459 : vector<1x128xf32>
    %464 = arith.addf %460, %461 : vector<1x128xf32>
    %465 = arith.addf %463, %464 : vector<1x128xf32>
    %466 = arith.addf %465, %462 : vector<1x128xf32>
    %c4_88 = arith.constant 4 : index
    %467 = memref.load %arg5[%c4_88] : memref<5xf32, #tpu.memory_space<smem>>
    %468 = vector.broadcast %467 : f32 to vector<1x128xf32>
    %469 = arith.addf %466, %468 : vector<1x128xf32>
    %cst_89 = arith.constant 0.00999999977 : f32
    %470 = vector.broadcast %cst_89 : f32 to vector<1x128xf32>
    %471 = arith.mulf %470, %301 : vector<1x128xf32>
    %472 = arith.maximumf %301, %471 : vector<1x128xf32>
    %cst_90 = arith.constant 0.00999999977 : f32
    %473 = vector.broadcast %cst_90 : f32 to vector<1x128xf32>
    %474 = arith.mulf %473, %343 : vector<1x128xf32>
    %475 = arith.maximumf %343, %474 : vector<1x128xf32>
    %cst_91 = arith.constant 0.00999999977 : f32
    %476 = vector.broadcast %cst_91 : f32 to vector<1x128xf32>
    %477 = arith.mulf %476, %385 : vector<1x128xf32>
    %478 = arith.maximumf %385, %477 : vector<1x128xf32>
    %cst_92 = arith.constant 0.00999999977 : f32
    %479 = vector.broadcast %cst_92 : f32 to vector<1x128xf32>
    %480 = arith.mulf %479, %427 : vector<1x128xf32>
    %481 = arith.maximumf %427, %480 : vector<1x128xf32>
    %cst_93 = arith.constant 0.00999999977 : f32
    %482 = vector.broadcast %cst_93 : f32 to vector<1x128xf32>
    %483 = arith.mulf %482, %469 : vector<1x128xf32>
    %484 = arith.maximumf %469, %483 : vector<1x128xf32>
    %c0_94 = arith.constant 0 : index
    %485 = memref.load %arg6[%c0_94] : memref<15xf32, #tpu.memory_space<smem>>
    %486 = vector.broadcast %485 : f32 to vector<1x128xf32>
    %487 = arith.mulf %486, %472 : vector<1x128xf32>
    %c1_95 = arith.constant 1 : index
    %488 = memref.load %arg6[%c1_95] : memref<15xf32, #tpu.memory_space<smem>>
    %489 = vector.broadcast %488 : f32 to vector<1x128xf32>
    %490 = arith.mulf %489, %475 : vector<1x128xf32>
    %c2_96 = arith.constant 2 : index
    %491 = memref.load %arg6[%c2_96] : memref<15xf32, #tpu.memory_space<smem>>
    %492 = vector.broadcast %491 : f32 to vector<1x128xf32>
    %493 = arith.mulf %492, %478 : vector<1x128xf32>
    %c3_97 = arith.constant 3 : index
    %494 = memref.load %arg6[%c3_97] : memref<15xf32, #tpu.memory_space<smem>>
    %495 = vector.broadcast %494 : f32 to vector<1x128xf32>
    %496 = arith.mulf %495, %481 : vector<1x128xf32>
    %c4_98 = arith.constant 4 : index
    %497 = memref.load %arg6[%c4_98] : memref<15xf32, #tpu.memory_space<smem>>
    %498 = vector.broadcast %497 : f32 to vector<1x128xf32>
    %499 = arith.mulf %498, %484 : vector<1x128xf32>
    %500 = arith.addf %487, %490 : vector<1x128xf32>
    %501 = arith.addf %493, %496 : vector<1x128xf32>
    %502 = arith.addf %500, %501 : vector<1x128xf32>
    %503 = arith.addf %502, %499 : vector<1x128xf32>
    %c0_99 = arith.constant 0 : index
    %504 = memref.load %arg7[%c0_99] : memref<3xf32, #tpu.memory_space<smem>>
    %505 = vector.broadcast %504 : f32 to vector<1x128xf32>
    %506 = arith.addf %503, %505 : vector<1x128xf32>
    %c5_100 = arith.constant 5 : index
    %507 = memref.load %arg6[%c5_100] : memref<15xf32, #tpu.memory_space<smem>>
    %508 = vector.broadcast %507 : f32 to vector<1x128xf32>
    %509 = arith.mulf %508, %472 : vector<1x128xf32>
    %c6_101 = arith.constant 6 : index
    %510 = memref.load %arg6[%c6_101] : memref<15xf32, #tpu.memory_space<smem>>
    %511 = vector.broadcast %510 : f32 to vector<1x128xf32>
    %512 = arith.mulf %511, %475 : vector<1x128xf32>
    %c7_102 = arith.constant 7 : index
    %513 = memref.load %arg6[%c7_102] : memref<15xf32, #tpu.memory_space<smem>>
    %514 = vector.broadcast %513 : f32 to vector<1x128xf32>
    %515 = arith.mulf %514, %478 : vector<1x128xf32>
    %c8_103 = arith.constant 8 : index
    %516 = memref.load %arg6[%c8_103] : memref<15xf32, #tpu.memory_space<smem>>
    %517 = vector.broadcast %516 : f32 to vector<1x128xf32>
    %518 = arith.mulf %517, %481 : vector<1x128xf32>
    %c9_104 = arith.constant 9 : index
    %519 = memref.load %arg6[%c9_104] : memref<15xf32, #tpu.memory_space<smem>>
    %520 = vector.broadcast %519 : f32 to vector<1x128xf32>
    %521 = arith.mulf %520, %484 : vector<1x128xf32>
    %522 = arith.addf %509, %512 : vector<1x128xf32>
    %523 = arith.addf %515, %518 : vector<1x128xf32>
    %524 = arith.addf %522, %523 : vector<1x128xf32>
    %525 = arith.addf %524, %521 : vector<1x128xf32>
    %c1_105 = arith.constant 1 : index
    %526 = memref.load %arg7[%c1_105] : memref<3xf32, #tpu.memory_space<smem>>
    %527 = vector.broadcast %526 : f32 to vector<1x128xf32>
    %528 = arith.addf %525, %527 : vector<1x128xf32>
    %c10_106 = arith.constant 10 : index
    %529 = memref.load %arg6[%c10_106] : memref<15xf32, #tpu.memory_space<smem>>
    %530 = vector.broadcast %529 : f32 to vector<1x128xf32>
    %531 = arith.mulf %530, %472 : vector<1x128xf32>
    %c11_107 = arith.constant 11 : index
    %532 = memref.load %arg6[%c11_107] : memref<15xf32, #tpu.memory_space<smem>>
    %533 = vector.broadcast %532 : f32 to vector<1x128xf32>
    %534 = arith.mulf %533, %475 : vector<1x128xf32>
    %c12_108 = arith.constant 12 : index
    %535 = memref.load %arg6[%c12_108] : memref<15xf32, #tpu.memory_space<smem>>
    %536 = vector.broadcast %535 : f32 to vector<1x128xf32>
    %537 = arith.mulf %536, %478 : vector<1x128xf32>
    %c13_109 = arith.constant 13 : index
    %538 = memref.load %arg6[%c13_109] : memref<15xf32, #tpu.memory_space<smem>>
    %539 = vector.broadcast %538 : f32 to vector<1x128xf32>
    %540 = arith.mulf %539, %481 : vector<1x128xf32>
    %c14_110 = arith.constant 14 : index
    %541 = memref.load %arg6[%c14_110] : memref<15xf32, #tpu.memory_space<smem>>
    %542 = vector.broadcast %541 : f32 to vector<1x128xf32>
    %543 = arith.mulf %542, %484 : vector<1x128xf32>
    %544 = arith.addf %531, %534 : vector<1x128xf32>
    %545 = arith.addf %537, %540 : vector<1x128xf32>
    %546 = arith.addf %544, %545 : vector<1x128xf32>
    %547 = arith.addf %546, %543 : vector<1x128xf32>
    %c2_111 = arith.constant 2 : index
    %548 = memref.load %arg7[%c2_111] : memref<3xf32, #tpu.memory_space<smem>>
    %549 = vector.broadcast %548 : f32 to vector<1x128xf32>
    %550 = arith.addf %547, %549 : vector<1x128xf32>
    %551 = arith.negf %506 : vector<1x128xf32>
    %552 = math.exp %551 : vector<1x128xf32>
    %cst_112 = arith.constant 1.000000e+00 : f32
    %553 = vector.broadcast %cst_112 : f32 to vector<1x128xf32>
    %554 = arith.addf %553, %552 : vector<1x128xf32>
    %555 = arith.divf %553, %554 : vector<1x128xf32>
    %c0_113 = arith.constant 0 : index
    %c0_114 = arith.constant 0 : index
    %c0_115 = arith.constant 0 : index
    %556 = vector.load %arg9[%c0_113, %c0_114, %c0_115] : memref<3x1x128xf32, #tpu.memory_space<vmem>>, vector<1x1x128xf32>
    %557 = vector.shape_cast %556 : vector<1x1x128xf32> to vector<1x128xf32>
    %558 = vector.shape_cast %555 : vector<1x128xf32> to vector<1x1x128xf32>
    tpu.vector_store %arg9[%c0_113, %c0_114, %c0_115], %558 {strides = array<i32>} : memref<3x1x128xf32, #tpu.memory_space<vmem>>, vector<1x1x128xf32>,
    %559 = arith.negf %528 : vector<1x128xf32>
    %560 = math.exp %559 : vector<1x128xf32>
    %cst_116 = arith.constant 1.000000e+00 : f32
    %561 = vector.broadcast %cst_116 : f32 to vector<1x128xf32>
    %562 = arith.addf %561, %560 : vector<1x128xf32>
    %563 = arith.divf %561, %562 : vector<1x128xf32>
    %c1_117 = arith.constant 1 : index
    %c0_118 = arith.constant 0 : index
    %c0_119 = arith.constant 0 : index
    %564 = vector.load %arg9[%c1_117, %c0_118, %c0_119] : memref<3x1x128xf32, #tpu.memory_space<vmem>>, vector<1x1x128xf32>
    %565 = vector.shape_cast %564 : vector<1x1x128xf32> to vector<1x128xf32>
    %566 = vector.shape_cast %563 : vector<1x128xf32> to vector<1x1x128xf32>
    tpu.vector_store %arg9[%c1_117, %c0_118, %c0_119], %566 {strides = array<i32>} : memref<3x1x128xf32, #tpu.memory_space<vmem>>, vector<1x1x128xf32>,
    %567 = arith.negf %550 : vector<1x128xf32>
    %568 = math.exp %567 : vector<1x128xf32>
    %cst_120 = arith.constant 1.000000e+00 : f32
    %569 = vector.broadcast %cst_120 : f32 to vector<1x128xf32>
    %570 = arith.addf %569, %568 : vector<1x128xf32>
    %571 = arith.divf %569, %570 : vector<1x128xf32>
    %c2_121 = arith.constant 2 : index
    %c0_122 = arith.constant 0 : index
    %c0_123 = arith.constant 0 : index
    %572 = vector.load %arg9[%c2_121, %c0_122, %c0_123] : memref<3x1x128xf32, #tpu.memory_space<vmem>>, vector<1x1x128xf32>
    %573 = vector.shape_cast %572 : vector<1x1x128xf32> to vector<1x128xf32>
    %574 = vector.shape_cast %571 : vector<1x128xf32> to vector<1x1x128xf32>
    tpu.vector_store %arg9[%c2_121, %c0_122, %c0_123], %574 {strides = array<i32>} : memref<3x1x128xf32, #tpu.memory_space<vmem>>, vector<1x1x128xf32>,
    %575 = arith.cmpf ogt, %528, %506 : vector<1x128xf32>
    %c1_i32 = arith.constant 1 : i32
    %c0_i32 = arith.constant 0 : i32
    %576 = vector.broadcast %c1_i32 : i32 to vector<1x128xi32>
    %577 = vector.broadcast %c0_i32 : i32 to vector<1x128xi32>
    %578 = arith.select %575, %576, %577 : vector<1x128xi1>, vector<1x128xi32>
    %579 = arith.maximumf %506, %528 : vector<1x128xf32>
    %580 = arith.cmpf ogt, %550, %579 : vector<1x128xf32>
    %c2_i32 = arith.constant 2 : i32
    %581 = vector.broadcast %c2_i32 : i32 to vector<1x128xi32>
    %582 = arith.select %580, %581, %578 : vector<1x128xi1>, vector<1x128xi32>
    %c0_124 = arith.constant 0 : index
    %c0_125 = arith.constant 0 : index
    %583 = vector.load %arg8[%c0_124, %c0_125] : memref<1x128xi32, #tpu.memory_space<vmem>>, vector<1x128xi32>
    tpu.vector_store %arg8[%c0_124, %c0_125], %582 {strides = array<i32>} : memref<1x128xi32, #tpu.memory_space<vmem>>, vector<1x128xi32>,
    return
  }
  func.func @transform_0(%arg0: i32) -> (i32, i32, i32) {
    %c0_i32 = arith.constant 0 : i32
    %c0_i32_0 = arith.constant 0 : i32
    %c0_i32_1 = arith.constant 0 : i32
    return %c0_i32, %arg0, %c0_i32_0 : i32, i32, i32
  }
  func.func @transform_1(%arg0: i32) -> i32 {
    %c0_i32 = arith.constant 0 : i32
    %c0_i32_0 = arith.constant 0 : i32
    return %c0_i32 : i32
  }
  func.func @transform_2(%arg0: i32) -> i32 {
    %c0_i32 = arith.constant 0 : i32
    %c0_i32_0 = arith.constant 0 : i32
    return %c0_i32 : i32
  }
  func.func @transform_3(%arg0: i32) -> i32 {
    %c0_i32 = arith.constant 0 : i32
    %c0_i32_0 = arith.constant 0 : i32
    return %c0_i32 : i32
  }
  func.func @transform_4(%arg0: i32) -> i32 {
    %c0_i32 = arith.constant 0 : i32
    %c0_i32_0 = arith.constant 0 : i32
    return %c0_i32 : i32
  }
  func.func @transform_5(%arg0: i32) -> i32 {
    %c0_i32 = arith.constant 0 : i32
    %c0_i32_0 = arith.constant 0 : i32
    return %c0_i32 : i32
  }
  func.func @transform_6(%arg0: i32) -> i32 {
    %c0_i32 = arith.constant 0 : i32
    %c0_i32_0 = arith.constant 0 : i32
    return %c0_i32 : i32
  }
  func.func @transform_7(%arg0: i32) -> (i32, i32) {
    %c0_i32 = arith.constant 0 : i32
    %c0_i32_0 = arith.constant 0 : i32
    return %arg0, %c0_i32 : i32, i32
  }
  func.func @transform_8(%arg0: i32) -> (i32, i32, i32) {
    %c0_i32 = arith.constant 0 : i32
    %c0_i32_0 = arith.constant 0 : i32
    %c0_i32_1 = arith.constant 0 : i32
    return %c0_i32, %arg0, %c0_i32_0 : i32, i32, i32
  }
}

</mosaic_0001>

<bundles_post_ra>
// kernel: numnet_forward.1
= control target key start
LH: loop header
LB: loop body
LE: loop exit
PB: predicated region body
PF: predicated region fallthrough
CT: control target
= control target key end

     0   :  { %14 = vsyncpa [#allocation3], 0  ;;  %s1547_s0 = inlined_call_operand.vmem [shape: f32[5,1,128], index: 0, kind: input, shape index: {}]   ;;  %s1548_s1 = inlined_call_operand.vmem [shape: f32[50], index: 1, kind: input, shape index: {}]   ;;  %s1549_s2 = inlined_call_operand.vmem [shape: f32[10], index: 2, kind: input, shape index: {}]   ;;  %s1550_s3 = inlined_call_operand.vmem [shape: f32[50], index: 3, kind: input, shape index: {}]   ;;  %s1551_s4 = inlined_call_operand.vmem [shape: f32[5], index: 4, kind: input, shape index: {}]   ;;  %s1552_s5 = inlined_call_operand.vmem [shape: f32[15], index: 5, kind: input, shape index: {}]   ;;  %s1553_s6 = inlined_call_operand.vmem [shape: f32[3], index: 6, kind: input, shape index: {}]   ;;  %s1554_s7 = inlined_call_operand.vmem [shape: s32[1,128], index: 7, kind: output, shape index: {0}]   ;;  %s1555_s8 = inlined_call_operand.vmem [shape: f32[3,1,128], index: 8, kind: output, shape index: {1}]  }
   0x1   :  { %15 = vsyncpa [#allocation5], 0 }
   0x2   :  { %16 = vsyncpa [#allocation8], 0  ;;  %s36_s29 = sshll.u32 %s1549_s2, 4  ;;  %s37_s29 = int_to_ptr.vmem [resolvable:$true] %s36_s29 }
   0x3   :  { %17 = vsyncpa [#allocation11], 0  ;;  %s56_s10 = sshll.u32 %s1551_s4, 4  ;;  %s830_s11 = scalar_lea.vmem %s37_s29, 16  ;;  %s57_s10 = int_to_ptr.vmem [resolvable:$true] %s56_s10 }
   0x4   :  { %p831_p0 = scmp.ne.s32.totalorder %s37_s29, %s830_s11  ;;  %p835_p1 = scmp.lt.s32.totalorder %s37_s29, %s37_s29 }
   0x5   :  { %p836_p2 = scmp.lt.s32.totalorder %s830_s11, %s830_s11 }
   0x7   :  { %p837_p3 = por %p836_p2, %p835_p1 }
   0x9   :  { %p838_p4 = pnand %p837_p3, %p831_p0 }
   0xb   :  { %841 = shalt.err (!%p838_p4)
}
   0xc   :  { %s910_s12 = smov [#allocation4]   ;;  %s842_s13 = scalar_lea.vmem %s57_s10, 16 }
   0xd   :  { %39 = dma.vmem_to_smem %s37_s29, 16, %s910_s12, [#allocation5]  }
   0xe   :  { %p843_p5 = scmp.ne.s32.totalorder %s57_s10, %s842_s13  ;;  %p847_p6 = scmp.lt.s32.totalorder %s57_s10, %s57_s10 }
   0xf   :  { %p848_p7 = scmp.lt.s32.totalorder %s842_s13, %s842_s13 }
  0x11   :  { %p849_p8 = por %p848_p7, %p847_p6 }
  0x13   :  { %p850_p9 = pnand %p849_p8, %p843_p5 }
  0x15   :  { %853 = shalt.err (!%p850_p9)
}
  0x16   :  { %s911_s2 = smov [#allocation7]   ;;  %s26_s15 = sshll.u32 %s1548_s1, 4  ;;  %s27_s15 = int_to_ptr.vmem [resolvable:$true] %s26_s15 }
  0x17   :  { %59 = dma.vmem_to_smem %s57_s10, 16, %s911_s2, [#allocation8]  }
  0x18   :  { %s46_s18 = sshll.u32 %s1550_s3, 4  ;;  %s854_s19 = scalar_lea.vmem %s27_s15, 16  ;;  %s47_s18 = int_to_ptr.vmem [resolvable:$true] %s46_s18 }
  0x19   :  { %p855_p10 = scmp.ne.s32.totalorder %s27_s15, %s854_s19  ;;  %p859_p11 = scmp.lt.s32.totalorder %s27_s15, %s27_s15 }
  0x1a   :  { %p860_p12 = scmp.lt.s32.totalorder %s854_s19, %s854_s19 }
  0x1c   :  { %p861_p13 = por %p860_p12, %p859_p11 }
  0x1e   :  { %p862_p0 = pnand %p861_p13, %p855_p10 }
  0x20   :  { %865 = shalt.err (!%p862_p0)
}
  0x21   :  { %s912_s20 = smov [#allocation2]   ;;  %s866_s21 = scalar_lea.vmem %s47_s18, 16 }
  0x22   :  { %29 = dma.vmem_to_smem %s27_s15, 16, %s912_s20, [#allocation3]  }
  0x23   :  { %p867_p1 = scmp.ne.s32.totalorder %s47_s18, %s866_s21  ;;  %p871_p2 = scmp.lt.s32.totalorder %s47_s18, %s47_s18 }
  0x24   :  { %p872_p3 = scmp.lt.s32.totalorder %s866_s21, %s866_s21 }
  0x26   :  { %p873_p4 = por %p872_p3, %p871_p2 }
  0x28   :  { %p874_p5 = pnand %p873_p4, %p867_p1 }
  0x2a   :  { %877 = shalt.err (!%p874_p5)
}
  0x2b   :  { %s913_s1 = smov [#allocation6]   ;;  %s66_s23 = sshll.u32 %s1552_s5, 4  ;;  %s67_s23 = int_to_ptr.vmem [resolvable:$true] %s66_s23 }
  0x2c   :  { %49 = dma.vmem_to_smem %s47_s18, 16, %s913_s1, [#allocation5]  }
  0x2d   :  { %s76_s26 = sshll.u32 %s1553_s6, 4  ;;  %s878_s27 = scalar_lea.vmem %s67_s23, 16  ;;  %s77_s26 = int_to_ptr.vmem [resolvable:$true] %s76_s26 }
  0x2e   :  { %p879_p6 = scmp.ne.s32.totalorder %s67_s23, %s878_s27  ;;  %p883_p7 = scmp.lt.s32.totalorder %s67_s23, %s67_s23 }
  0x2f   :  { %p884_p8 = scmp.lt.s32.totalorder %s878_s27, %s878_s27 }
  0x31   :  { %p885_p9 = por %p884_p8, %p883_p7 }
  0x33   :  { %p886_p10 = pnand %p885_p9, %p879_p6 }
  0x35   :  { %889 = shalt.err (!%p886_p10)
}
  0x36   :  { %s914_s28 = smov [#allocation9]   ;;  %s890_s29 = scalar_lea.vmem %s77_s26, 16 }
  0x37   :  { %69 = dma.vmem_to_smem %s67_s23, 16, %s914_s28, [#allocation8]  }
  0x38   :  { %p891_p11 = scmp.ne.s32.totalorder %s77_s26, %s890_s29  ;;  %p895_p12 = scmp.lt.s32.totalorder %s77_s26, %s77_s26 }
  0x39   :  { %p896_p13 = scmp.lt.s32.totalorder %s890_s29, %s890_s29 }
  0x3b   :  { %p897_p0 = por %p896_p13, %p895_p12 }
  0x3d   :  { %p898_p1 = pnand %p897_p0, %p891_p11 }
  0x3f   :  { %901 = shalt.err (!%p898_p1)
}
  0x40   :  { %s915_s5 = smov [#allocation10]  }
  0x41   :  { %79 = dma.vmem_to_smem %s77_s26, 16, %s915_s5, [#allocation11]  }
  0x42   :  { %902 = dma.done.wait [#allocation3], 16  }
  0x43   :  { %903 = vsyncadd [#allocation3], 4294967280 }
  0x44   :  { %904 = dma.done.wait [#allocation5], 32  }
  0x45   :  { %905 = vsyncadd [#allocation5], 4294967264 }
  0x46   :  { %906 = dma.done.wait [#allocation8], 32  }
  0x47   :  { %907 = vsyncadd [#allocation8], 4294967264 }
  0x48   :  { %908 = dma.done.wait [#allocation11], 16  }
  0x49   :  { %909 = vsyncadd [#allocation11], 4294967280 }
  0x4a   :  { %98 = sfence }
  0x4b   :  { %s108_s6 = sld [smem:[#allocation2]]  ;;  %s679_s30 = sld [smem:[#allocation2 + $0x1]]  ;;  %v983_v0 = vld [vmem:[%s1547_s0] sm:$0x1]  ;;  %v988_v1 = vld [vmem:[%s1547_s0 + $0x1] sm:$0x1] }
  0x4c   :  { %s680_s9 = sld [smem:[#allocation2 + $0x2]]  ;;  %s681_s12 = sld [smem:[#allocation2 + $0x3]]  ;;  %v995_v2 = vld [vmem:[%s1547_s0 + $0x2] sm:$0x1]  ;;  %v1004_v3 = vld [vmem:[%s1547_s0 + $0x3] sm:$0x1] }
  0x4d   :  { %s682_s13 = sld [smem:[#allocation2 + $0x4]]  ;;  %s990_s14 = sld [smem:[#allocation4]]  ;;  %v1013_v4 = vld [vmem:[%s1547_s0 + $0x4] sm:$0x1] }
  0x4e   :  { %s683_s15 = sld [smem:[#allocation2 + $0x5]]  ;;  %s997_s18 = sld [smem:[#allocation2 + $0x6]] }
  0x4f   :  { %s999_s19 = sld [smem:[#allocation2 + $0x7]]  ;;  %s1006_s1 = sld [smem:[#allocation2 + $0x8]] }
  0x50   :  { %s1008_s3 = sld [smem:[#allocation2 + $0x9]]  ;;  %s1017_s25 = sld [smem:[#allocation2 + $0xa]] }
  0x51   :  { %v109_v5 = vstv %s108_s6  ;;  %s1015_s24 = sld [smem:[#allocation4 + $0x1]]  ;;  %v112_v7 = vstv %s679_s30  ;;  %s1020_s26 = sld [smem:[#allocation2 + $0xb]] }
  0x52   :  { %v110_v6 = vmul.f32 %v109_v5, %v983_v0  ;;  %v115_v8 = vstv %s680_s9  ;;  %s1022_s27 = sld [smem:[#allocation2 + $0xc]]  ;;  %v113_v9 = vmul.f32 %v988_v1, %v112_v7  ;;  %v118_v11 = vstv %s681_s12  ;;  %s1026_s0 = sld [smem:[#allocation2 + $0xd]] }
  0x53   :  { %v116_v10 = vmul.f32 %v995_v2, %v115_v8  ;;  %v121_v12 = vstv %s682_s13  ;;  %s1028_s28 = sld [smem:[#allocation2 + $0xe]]  ;;  %v119_v13 = vmul.f32 %v1004_v3, %v118_v11  ;;  %v128_v15 = vstv %s990_s14  ;;  %s1033_s29 = sld [smem:[#allocation4 + $0x2]] }
  0x54   :  { %v122_v14 = vmul.f32 %v1013_v4, %v121_v12  ;;  %v131_v16 = vstv %s683_s15  ;;  %s1035_s5 = sld [smem:[#allocation2 + $0xf]]  ;;  %v123_v17 = vadd.f32 %v113_v9, %v110_v6  ;;  %v134_v19 = vstv %s997_s18  ;;  %s1040_s6 = sld [smem:[#allocation2 + $0x10]] }
  0x55   :  { %v132_v18 = vmul.f32 %v131_v16, %v983_v0  ;;  %v137_v20 = vstv %s999_s19  ;;  %s1042_s30 = sld [smem:[#allocation2 + $0x11]]  ;;  %v124_v21 = vadd.f32 %v119_v13, %v116_v10  ;;  %v135_v22 = vmul.f32 %v988_v1, %v134_v19  ;;  %s1047_s9 = sld [smem:[#allocation2 + $0x12]] }
  0x56   :  { %v138_v23 = vmul.f32 %v995_v2, %v137_v20  ;;  %v140_v24 = vstv %s1006_s1  ;;  %v143_v26 = vstv %s1008_s3  ;;  %v153_v28 = vstv %s1017_s25  ;;  %s1053_s10 = sld [smem:[#allocation2 + $0x13]]  ;;  %s1059_s12 = sld [smem:[#allocation2 + $0x14]] }
  0x57   :  { %v141_v25 = vmul.f32 %v1004_v3, %v140_v24  ;;  %v150_v27 = vstv %s1015_s24  ;;  %s1055_s11 = sld [smem:[#allocation4 + $0x3]]  ;;  %v125_v29 = vadd.f32 %v124_v21, %v123_v17  ;;  %v144_v30 = vmul.f32 %v1013_v4, %v143_v26  ;;  %s1064_s13 = sld [smem:[#allocation2 + $0x15]] }
  0x58   :  { %v145_v31 = vadd.f32 %v135_v22, %v132_v18  ;;  %v154_v32 = vmul.f32 %v153_v28, %v983_v0  ;;  %v156_v34 = vstv %s1020_s26  ;;  %v159_v35 = vstv %s1022_s27  ;;  %s1066_s2 = sld [smem:[#allocation2 + $0x16]]  ;;  %s1071_s4 = sld [smem:[#allocation2 + $0x17]] }
  0x59   :  { %v146_v33 = vadd.f32 %v141_v25, %v138_v23  ;;  %v162_v36 = vstv %s1026_s0  ;;  %v126_v37 = vadd.f32 %v125_v29, %v122_v14  ;;  %v157_v38 = vmul.f32 %v988_v1, %v156_v34  ;;  %s1076_s14 = sld [smem:[#allocation2 + $0x18]]  ;;  %s1078_s15 = sld [smem:[#allocation4 + $0x4]] }
  0x5a   :  { %v160_v39 = vmul.f32 %v995_v2, %v159_v35  ;;  %v163_v40 = vmul.f32 %v1004_v3, %v162_v36  ;;  %v165_v42 = vstv %s1028_s28  ;;  %v172_v43 = vstv %s1033_s29  ;;  %s1083_s16 = sld [smem:[#allocation2 + $0x19]]  ;;  %s1085_s17 = sld [smem:[#allocation2 + $0x1a]] }
  0x5b   :  { %v147_v41 = vadd.f32 %v146_v33, %v145_v31  ;;  %v175_v44 = vstv %s1035_s5  ;;  %v1080_v45 = vadd.f32 %v128_v15, %v126_v37  ;;  %v166_v46 = vmul.f32 %v1013_v4, %v165_v42  ;;  %s1090_s18 = sld [smem:[#allocation2 + $0x1b]]  ;;  %s1092_s19 = sld [smem:[#allocation2 + $0x1c]] }
  0x5c   :  { %v167_v47 = vadd.f32 %v157_v38, %v154_v32  ;;  %v168_v48 = vadd.f32 %v163_v40, %v160_v39  ;;  %v176_v50 = vmul.f32 %v175_v44, %v983_v0  ;;  %v178_v51 = vstv %s1040_s6  ;;  %s1097_s20 = sld [smem:[#allocation2 + $0x1d]]  ;;  %s1108_s1 = sld [smem:[#allocation2 + $0x1e]] }
  0x5d   :  { %v148_v49 = vadd.f32 %v147_v41, %v144_v30  ;;  %v181_v52 = vstv %s1042_s30  ;;  %v179_v54 = vmul.f32 %v988_v1, %v178_v51  ;;  %v184_v56 = vstv %s1047_s9  ;;  %s1099_s21 = sld [smem:[#allocation4 + $0x5]]  ;;  %s1110_s3 = sld [smem:[#allocation2 + $0x1f]] }
  0x5e   :  { %v169_v53 = vadd.f32 %v168_v48, %v167_v47  ;;  %v182_v55 = vmul.f32 %v995_v2, %v181_v52  ;;  %v185_v58 = vmul.f32 %v1004_v3, %v184_v56  ;;  %v187_v59 = vstv %s1053_s10  ;;  %s1115_s22 = sld [smem:[#allocation2 + $0x20]]  ;;  %s1117_s23 = sld [smem:[#allocation2 + $0x21]] }
  0x5f   :  { %v1101_v57 = vadd.f32 %v150_v27, %v148_v49  ;;  %v194_v60 = vstv %s1055_s11  ;;  %v188_v62 = vmul.f32 %v1013_v4, %v187_v59  ;;  %v189_v63 = vadd.f32 %v179_v54, %v176_v50  ;;  %s1124_s24 = sld [smem:[#allocation2 + $0x22]]  ;;  %s1126_s25 = sld [smem:[#allocation4 + $0x6]] }
  0x60   :  { %v170_v61 = vadd.f32 %v169_v53, %v166_v46  ;;  %v197_v5 = vstv %s1059_s12  ;;  %v190_v6 = vadd.f32 %v185_v58, %v182_v55  ;;  %v200_v8 = vstv %s1064_s13  ;;  %s1134_s26 = sld [smem:[#allocation2 + $0x23]]  ;;  %s1136_s27 = sld [smem:[#allocation2 + $0x24]] }
  0x61   :  { %v198_v7 = vmul.f32 %v197_v5, %v983_v0  ;;  %v203_v9 = vstv %s1066_s2  ;;  %v201_v11 = vmul.f32 %v988_v1, %v200_v8  ;;  %v206_v13 = vstv %s1071_s4  ;;  %s1140_s0 = sld [smem:[#allocation2 + $0x25]]  ;;  %s1142_s28 = sld [smem:[#allocation2 + $0x26]] }
  0x62   :  { %v1119_v10 = vadd.f32 %v172_v43, %v170_v61  ;;  %v204_v12 = vmul.f32 %v995_v2, %v203_v9  ;;  %v191_v14 = vadd.f32 %v190_v6, %v189_v63  ;;  %v207_v15 = vmul.f32 %v1004_v3, %v206_v13  ;;  %s1148_s29 = sld [smem:[#allocation2 + $0x27]]  ;;  %s1159_s6 = sld [smem:[#allocation2 + $0x28]] }
  0x63   :  { %v209_v16 = vstv %s1076_s14  ;;  %v216_v17 = vstv %s1078_s15  ;;  %v211_v19 = vadd.f32 %v201_v11, %v198_v7  ;;  %v219_v20 = vstv %s1083_s16  ;;  %s1150_s5 = sld [smem:[#allocation4 + $0x7]]  ;;  %s1161_s30 = sld [smem:[#allocation2 + $0x29]] }
  0x64   :  { %v210_v18 = vmul.f32 %v1013_v4, %v209_v16  ;;  %v222_v21 = vstv %s1085_s17  ;;  %v192_v22 = vadd.f32 %v191_v14, %v188_v62  ;;  %v212_v23 = vadd.f32 %v207_v15, %v204_v12  ;;  %s1165_s9 = sld [smem:[#allocation2 + $0x2a]]  ;;  %s1167_s10 = sld [smem:[#allocation2 + $0x2b]] }
  0x65   :  { %v220_v24 = vmul.f32 %v219_v20, %v983_v0  ;;  %v223_v25 = vmul.f32 %v988_v1, %v222_v21  ;;  %v225_v26 = vstv %s1090_s18  ;;  %v228_v27 = vstv %s1092_s19  ;;  %s1173_s11 = sld [smem:[#allocation2 + $0x2c]]  ;;  %s1175_s12 = sld [smem:[#allocation4 + $0x8]] }
  0x66   :  { %v231_v28 = vstv %s1097_s20  ;;  %v238_v29 = vstv %s1099_s21  ;;  %v1152_v30 = vadd.f32 %v194_v60, %v192_v22  ;;  %v213_v31 = vadd.f32 %v212_v23, %v211_v19  ;;  %s1184_s13 = sld [smem:[#allocation2 + $0x2d]]  ;;  %s1186_s2 = sld [smem:[#allocation2 + $0x2e]] }
  0x67   :  { %v226_v32 = vmul.f32 %v995_v2, %v225_v26  ;;  %v229_v33 = vmul.f32 %v1004_v3, %v228_v27  ;;  %v232_v34 = vmul.f32 %v1013_v4, %v231_v28  ;;  %v233_v35 = vadd.f32 %v223_v25, %v220_v24  ;;  %s1190_s4 = sld [smem:[#allocation2 + $0x2f]]  ;;  %s1192_s14 = sld [smem:[#allocation2 + $0x30]] }
  0x68   :  { %v241_v36 = vstv %s1108_s1  ;;  %v244_v37 = vstv %s1110_s3  ;;  %v214_v38 = vadd.f32 %v213_v31, %v210_v18  ;;  %v247_v42 = vstv %s1115_s22  ;;  %s1198_s15 = sld [smem:[#allocation2 + $0x31]]  ;;  %s1220_s17 = sld [smem:[#allocation6]] }
  0x69   :  { %v234_v39 = vadd.f32 %v229_v33, %v226_v32  ;;  %v242_v40 = vmul.f32 %v241_v36, %v983_v0  ;;  %v245_v41 = vmul.f32 %v988_v1, %v244_v37  ;;  %v250_v43 = vstv %s1117_s23  ;;  %s1200_s16 = sld [smem:[#allocation4 + $0x9]]  ;;  %s1226_s19 = sld [smem:[#allocation6 + $0x2]] }
  0x6a   :  { %v253_v44 = vstv %s1124_s24  ;;  %v260_v46 = vstv %s1126_s25  ;;  %v1177_v47 = vadd.f32 %v216_v17, %v214_v38  ;;  %v248_v49 = vmul.f32 %v995_v2, %v247_v42  ;;  %s1224_s18 = sld [smem:[#allocation6 + $0x1]]  ;;  %s1232_s20 = sld [smem:[#allocation6 + $0x3]] }
  0x6b   :  { %v235_v48 = vadd.f32 %v234_v39, %v233_v35  ;;  %v251_v50 = vmul.f32 %v1004_v3, %v250_v43  ;;  %v254_v51 = vmul.f32 %v1013_v4, %v253_v44  ;;  %v255_v52 = vadd.f32 %v245_v41, %v242_v40  ;;  %s1234_s21 = sld [smem:[#allocation6 + $0x4]]  ;;  %s1238_s1 = sld [smem:[#allocation6 + $0x5]] }
  0x6c   :  { %v263_v53 = vstv %s1134_s26  ;;  %v266_v54 = vstv %s1136_s27  ;;  %v269_v60 = vstv %s1140_s0  ;;  %v272_v61 = vstv %s1142_s28  ;;  %s1240_s3 = sld [smem:[#allocation6 + $0x6]]  ;;  %s1245_s22 = sld [smem:[#allocation6 + $0x7]] }
  0x6d   :  { %v236_v55 = vadd.f32 %v235_v48, %v232_v34  ;;  %v256_v56 = vadd.f32 %v251_v50, %v248_v49  ;;  %v264_v58 = vmul.f32 %v263_v53, %v983_v0  ;;  %v267_v59 = vmul.f32 %v988_v1, %v266_v54  ;;  %s1249_s23 = sld [smem:[#allocation6 + $0x8]]  ;;  %s1259_s24 = sld [smem:[#allocation6 + $0x9]] }
  0x6e   :  { %v275_v62 = vstv %s1148_s29  ;;  %v282_v63 = vstv %s1150_s5  ;;  %v270_v7 = vmul.f32 %v995_v2, %v269_v60  ;;  %v273_v8 = vmul.f32 %v1004_v3, %v272_v61  ;;  %s1267_s25 = sld [smem:[#allocation7]]  ;;  %s1275_s26 = sld [smem:[#allocation6 + $0xa]] }
  0x6f   :  { %v1202_v5 = vadd.f32 %v238_v29, %v236_v55  ;;  %v257_v6 = vadd.f32 %v256_v56, %v255_v52  ;;  %v276_v9 = vmul.f32 %v1013_v4, %v275_v62  ;;  %v277_v11 = vadd.f32 %v267_v59, %v264_v58  ;;  %s1279_s27 = sld [smem:[#allocation6 + $0xb]]  ;;  %s1287_s0 = sld [smem:[#allocation6 + $0xc]] }
  0x70   :  { %v285_v12 = vstv %s1159_s6  ;;  %v288_v13 = vstv %s1161_s30  ;;  %v278_v15 = vadd.f32 %v273_v8, %v270_v7  ;;  %v291_v18 = vstv %s1165_s9  ;;  %s1289_s28 = sld [smem:[#allocation6 + $0xd]]  ;;  %s1295_s29 = sld [smem:[#allocation6 + $0xe]] }
  0x71   :  { %v258_v14 = vadd.f32 %v257_v6, %v254_v51  ;;  %v286_v16 = vmul.f32 %v285_v12, %v983_v0  ;;  %v289_v17 = vmul.f32 %v988_v1, %v288_v13  ;;  %v294_v19 = vstv %s1167_s10  ;;  %s1297_s5 = sld [smem:[#allocation6 + $0xf]]  ;;  %s1303_s6 = sld [smem:[#allocation6 + $0x10]] }
  0x72   :  { %v297_v20 = vstv %s1173_s11  ;;  %v304_v21 = vstv %s1175_s12  ;;  %v279_v23 = vadd.f32 %v278_v15, %v277_v11  ;;  %v292_v24 = vmul.f32 %v995_v2, %v291_v18  ;;  %s1305_s30 = sld [smem:[#allocation6 + $0x11]]  ;;  %s1314_s9 = sld [smem:[#allocation6 + $0x12]] }
  0x73   :  { %v261_v22 = vadd.f32 %v260_v46, %v258_v14  ;;  %v295_v25 = vmul.f32 %v1004_v3, %v294_v19  ;;  %v298_v26 = vmul.f32 %v1013_v4, %v297_v20  ;;  %v299_v27 = vadd.f32 %v289_v17, %v286_v16  ;;  %s1316_s10 = sld [smem:[#allocation6 + $0x13]]  ;;  %s1324_s11 = sld [smem:[#allocation7 + $0x1]] }
  0x74   :  { %v307_v28 = vstv %s1184_s13  ;;  %v310_v29 = vstv %s1186_s2  ;;  %v280_v31 = vadd.f32 %v279_v23, %v276_v9  ;;  %v313_v35 = vstv %s1190_s4  ;;  %s1326_s12 = sld [smem:[#allocation6 + $0x14]]  ;;  %s1331_s13 = sld [smem:[#allocation6 + $0x15]] }
  0x75   :  { %v300_v32 = vadd.f32 %v295_v25, %v292_v24  ;;  %v308_v33 = vmul.f32 %v307_v28, %v983_v0  ;;  %v311_v34 = vmul.f32 %v988_v1, %v310_v29  ;;  %v316_v36 = vstv %s1192_s14  ;;  %s1336_s2 = sld [smem:[#allocation6 + $0x16]]  ;;  %s1338_s4 = sld [smem:[#allocation6 + $0x17]] }
  0x76   :  { %v319_v37 = vstv %s1198_s15  ;;  %v326_v38 = vstv %s1200_s16  ;;  %v283_v39 = vadd.f32 %v282_v63, %v280_v31  ;;  %v314_v41 = vmul.f32 %v995_v2, %v313_v35  ;;  %s1342_s14 = sld [smem:[#allocation6 + $0x18]]  ;;  %s1348_s15 = sld [smem:[#allocation6 + $0x19]] }
  0x77   :  { %v301_v40 = vadd.f32 %v300_v32, %v299_v27  ;;  %v317_v0 = vmul.f32 %v1004_v3, %v316_v36  ;;  %v320_v1 = vmul.f32 %v1013_v4, %v319_v37  ;;  %v321_v42 = vadd.f32 %v311_v34, %v308_v33  ;;  %s1350_s16 = sld [smem:[#allocation6 + $0x1a]] }
  0x78   :  { %v328_v43 = vmul.f32 0.01, %v1080_v45  ;;  %v330_v44 = vmul.f32 0.01, %v1101_v57  ;;  %v332_v49 = vmul.f32 0.01, %v1119_v10  ;;  %v349_v60 = vstv %s1220_s17 }
  0x79   :  { %v302_v46 = vadd.f32 %v301_v40, %v298_v26  ;;  %v322_v48 = vadd.f32 %v317_v0, %v314_v41  ;;  %v334_v2 = vmul.f32 0.01, %v1152_v30  ;;  %v336_v50 = vmul.f32 0.01, %v1177_v47  ;;  %s1355_s17 = sld [smem:[#allocation6 + $0x1b]] }
  0x7a   :  { %v1252_v3 = vmax.f32 %v1080_v45, %v328_v43  ;;  %v1255_v4 = vmax.f32 %v1101_v57, %v330_v44  ;;  %v338_v51 = vmul.f32 0.01, %v1202_v5  ;;  %v1262_v54 = vmax.f32 %v1119_v10, %v332_v49 }
  0x7b   :  { %v305_v52 = vadd.f32 %v304_v21, %v302_v46  ;;  %v323_v53 = vadd.f32 %v322_v48, %v321_v42  ;;  %v1265_v55 = vmax.f32 %v1152_v30, %v334_v2  ;;  %v1270_v45 = vmax.f32 %v1177_v47, %v336_v50 }
  0x7c   :  { %v1273_v57 = vmax.f32 %v1202_v5, %v338_v51  ;;  %v340_v56 = vmul.f32 0.01, %v261_v22  ;;  %v342_v58 = vmul.f32 0.01, %v283_v39  ;;  %v352_v61 = vstv %s1224_s18  ;;  %s1357_s18 = sld [smem:[#allocation6 + $0x1c]] }
  0x7d   :  { %v324_v59 = vadd.f32 %v323_v53, %v320_v1  ;;  %v344_v10 = vmul.f32 0.01, %v305_v52  ;;  %v350_v62 = vmul.f32 %v349_v60, %v1252_v3  ;;  %v353_v63 = vmul.f32 %v352_v61, %v1255_v4 }
  0x7e   :  { %v1281_v30 = vmax.f32 %v261_v22, %v340_v56  ;;  %v1283_v47 = vmax.f32 %v283_v39, %v342_v58  ;;  %v355_v7 = vstv %s1226_s19  ;;  %v358_v8 = vstv %s1232_s20  ;;  %s1362_s19 = sld [smem:[#allocation6 + $0x1d]]  ;;  %s1368_s20 = sld [smem:[#allocation7 + $0x2]] }
  0x7f   :  { %v327_v5 = vadd.f32 %v326_v38, %v324_v59  ;;  %v1291_v6 = vmax.f32 %v305_v52, %v344_v10  ;;  %v356_v9 = vmul.f32 %v355_v7, %v1262_v54  ;;  %v359_v11 = vmul.f32 %v358_v8, %v1265_v55 }
  0x80   :  { %v361_v12 = vstv %s1234_s21  ;;  %v364_v13 = vstv %s1238_s1  ;;  %v367_v17 = vstv %s1240_s3  ;;  %v370_v19 = vstv %s1245_s22  ;;  %s1370_s21 = sld [smem:[#allocation6 + $0x1e]]  ;;  %s1375_s1 = sld [smem:[#allocation6 + $0x1f]] }
  0x81   :  { %v346_v14 = vmul.f32 0.01, %v327_v5  ;;  %v362_v15 = vmul.f32 %v361_v12, %v1270_v45  ;;  %v365_v16 = vmul.f32 %v364_v13, %v1273_v57  ;;  %v368_v18 = vmul.f32 %v367_v17, %v1281_v30  ;;  %s1380_s3 = sld [smem:[#allocation6 + $0x20]]  ;;  %s1382_s22 = sld [smem:[#allocation6 + $0x21]] }
  0x82   :  { %v373_v20 = vstv %s1249_s23  ;;  %v376_v21 = vstv %s1259_s24  ;;  %v371_v23 = vmul.f32 %v370_v19, %v1283_v47  ;;  %v378_v25 = vadd.f32 %v353_v63, %v350_v62  ;;  %s1388_s23 = sld [smem:[#allocation6 + $0x22]]  ;;  %s1390_s24 = sld [smem:[#allocation6 + $0x23]] }
  0x83   :  { %v1318_v22 = vmax.f32 %v327_v5, %v346_v14  ;;  %v374_v24 = vmul.f32 %v373_v20, %v1291_v6  ;;  %v379_v26 = vadd.f32 %v359_v11, %v356_v9  ;;  %v380_v27 = vadd.f32 %v365_v16, %v362_v15 }
  0x84   :  { %v388_v28 = vstv %s1267_s25  ;;  %v391_v29 = vstv %s1275_s26  ;;  %v381_v32 = vadd.f32 %v371_v23, %v368_v18  ;;  %v394_v34 = vstv %s1279_s27  ;;  %s1395_s25 = sld [smem:[#allocation6 + $0x24]]  ;;  %s1397_s26 = sld [smem:[#allocation6 + $0x25]] }
  0x85   :  { %v377_v31 = vmul.f32 %v376_v21, %v1318_v22  ;;  %v392_v33 = vmul.f32 %v391_v29, %v1252_v3  ;;  %v383_v35 = vadd.f32 %v379_v26, %v378_v25  ;;  %v395_v36 = vmul.f32 %v394_v34, %v1255_v4  ;;  %s1403_s27 = sld [smem:[#allocation6 + $0x26]] }
  0x86   :  { %v397_v37 = vstv %s1287_s0  ;;  %v400_v38 = vstv %s1289_s28  ;;  %v384_v40 = vadd.f32 %v381_v32, %v380_v27  ;;  %v403_v1 = vstv %s1295_s29  ;;  %s1405_s0 = sld [smem:[#allocation6 + $0x27]]  ;;  %s1411_s28 = sld [smem:[#allocation7 + $0x3]] }
  0x87   :  { %v382_v39 = vadd.f32 %v377_v31, %v374_v24  ;;  %v398_v41 = vmul.f32 %v397_v37, %v1262_v54  ;;  %v401_v0 = vmul.f32 %v400_v38, %v1265_v55  ;;  %v406_v42 = vstv %s1297_s5  ;;  %s1417_s29 = sld [smem:[#allocation6 + $0x28]]  ;;  %s1421_s5 = sld [smem:[#allocation6 + $0x29]] }
  0x88   :  { %v409_v43 = vstv %s1303_s6  ;;  %v412_v44 = vstv %s1305_s30  ;;  %v385_v46 = vadd.f32 %v384_v40, %v383_v35  ;;  %v404_v48 = vmul.f32 %v403_v1, %v1270_v45  ;;  %s1423_s6 = sld [smem:[#allocation6 + $0x2a]]  ;;  %s1428_s30 = sld [smem:[#allocation6 + $0x2b]] }
  0x89   :  { %v407_v49 = vmul.f32 %v406_v42, %v1273_v57  ;;  %v410_v2 = vmul.f32 %v409_v43, %v1281_v30  ;;  %v413_v50 = vmul.f32 %v412_v44, %v1283_v47  ;;  %v415_v51 = vstv %s1314_s9  ;;  %s1430_s9 = sld [smem:[#allocation6 + $0x2c]] }
  0x8a   :  { %v418_v52 = vstv %s1316_s10  ;;  %v420_v53 = vadd.f32 %v395_v36, %v392_v33  ;;  %v386_v56 = vadd.f32 %v385_v46, %v382_v39  ;;  %v416_v58 = vmul.f32 %v415_v51, %v1291_v6  ;;  %s1436_s10 = sld [smem:[#allocation6 + $0x2d]] }
  0x8b   :  { %v419_v59 = vmul.f32 %v418_v52, %v1318_v22  ;;  %v421_v10 = vadd.f32 %v401_v0, %v398_v41  ;;  %v422_v60 = vadd.f32 %v407_v49, %v404_v48  ;;  %v423_v61 = vadd.f32 %v413_v50, %v410_v2 }
  0x8c   :  { %v430_v62 = vstv %s1324_s11  ;;  %v433_v63 = vstv %s1326_s12  ;;  %v1372_v5 = vadd.f32 %v388_v28, %v386_v56  ;;  %v436_v12 = vstv %s1331_s13  ;;  %s1438_s11 = sld [smem:[#allocation6 + $0x2e]]  ;;  %s1443_s12 = sld [smem:[#allocation6 + $0x2f]] }
  0x8d   :  { %v424_v7 = vadd.f32 %v419_v59, %v416_v58  ;;  %v425_v8 = vadd.f32 %v421_v10, %v420_v53  ;;  %v434_v9 = vmul.f32 %v433_v63, %v1252_v3  ;;  %v426_v11 = vadd.f32 %v423_v61, %v422_v60  ;;  %s1449_s13 = sld [smem:[#allocation6 + $0x30]] }
  0x8e   :  { %v439_v13 = vstv %s1336_s2  ;;  %v442_v14 = vstv %s1338_s4  ;;  %v437_v15 = vmul.f32 %v436_v12, %v1255_v4  ;;  %v445_v18 = vstv %s1342_s14  ;;  %s1451_s2 = sld [smem:[#allocation6 + $0x31]]  ;;  %s1461_s4 = sld [smem:[#allocation9]] }
  0x8f   :  { %v440_v16 = vmul.f32 %v439_v13, %v1262_v54  ;;  %v443_v17 = vmul.f32 %v442_v14, %v1265_v55  ;;  %v427_v19 = vadd.f32 %v426_v11, %v425_v8  ;;  %v446_v20 = vmul.f32 %v445_v18, %v1270_v45  ;;  %s1466_s14 = sld [smem:[#allocation9 + $0x1]] }
  0x90   :  { %v448_v21 = vstv %s1348_s15  ;;  %v451_v23 = vstv %s1350_s16  ;;  %v454_v26 = vstv %s1355_s17  ;;  %v457_v27 = vstv %s1357_s18  ;;  %s1472_s15 = sld [smem:[#allocation9 + $0x2]]  ;;  %s1474_s16 = sld [smem:[#allocation9 + $0x3]] }
  0x91   :  { %v449_v24 = vmul.f32 %v448_v21, %v1273_v57  ;;  %v452_v25 = vmul.f32 %v451_v23, %v1281_v30  ;;  %v428_v28 = vadd.f32 %v427_v19, %v424_v7  ;;  %v455_v29 = vmul.f32 %v454_v26, %v1283_v47  ;;  %s1479_s17 = sld [smem:[#allocation7 + $0x4]]  ;;  %s1484_s18 = sld [smem:[#allocation9 + $0x5]] }
  0x92   :  { %v458_v31 = vmul.f32 %v457_v27, %v1291_v6  ;;  %v460_v32 = vstv %s1362_s19  ;;  %v462_v34 = vadd.f32 %v437_v15, %v434_v9  ;;  %v463_v35 = vadd.f32 %v443_v17, %v440_v16  ;;  %s1486_s19 = sld [smem:[#allocation9 + $0x6]] }
  0x93   :  { %v461_v33 = vmul.f32 %v460_v32, %v1318_v22  ;;  %v464_v36 = vadd.f32 %v449_v24, %v446_v20  ;;  %v1413_v37 = vadd.f32 %v430_v62, %v428_v28  ;;  %v465_v38 = vadd.f32 %v455_v29, %v452_v25 }
  0x94   :  { %v472_v39 = vstv %s1368_s20  ;;  %v475_v40 = vstv %s1370_s21  ;;  %v467_v0 = vadd.f32 %v463_v35, %v462_v34  ;;  %v478_v42 = vstv %s1375_s1  ;;  %s1491_s20 = sld [smem:[#allocation9 + $0x4]]  ;;  %s1494_s21 = sld [smem:[#allocation9 + $0x7]] }
  0x95   :  { %v466_v41 = vadd.f32 %v461_v33, %v458_v31  ;;  %v476_v1 = vmul.f32 %v475_v40, %v1252_v3  ;;  %v468_v43 = vadd.f32 %v465_v38, %v464_v36  ;;  %v479_v44 = vmul.f32 %v478_v42, %v1255_v4  ;;  %s1496_s1 = sld [smem:[#allocation9 + $0x8]] }
  0x96   :  { %v481_v46 = vstv %s1380_s3  ;;  %v484_v48 = vstv %s1382_s22  ;;  %v487_v50 = vstv %s1388_s23  ;;  %v490_v51 = vstv %s1390_s24  ;;  %s1499_s3 = sld [smem:[#allocation9 + $0x9]]  ;;  %s1503_s22 = sld [smem:[#allocation9 + $0xa]] }
  0x97   :  { %v482_v49 = vmul.f32 %v481_v46, %v1262_v54  ;;  %v485_v2 = vmul.f32 %v484_v48, %v1265_v55  ;;  %v469_v52 = vadd.f32 %v468_v43, %v467_v0  ;;  %v488_v53 = vmul.f32 %v487_v50, %v1270_v45  ;;  %s1505_s23 = sld [smem:[#allocation9 + $0xb]]  ;;  %s1509_s24 = sld [smem:[#allocation9 + $0xc]] }
  0x98   :  { %v491_v56 = vmul.f32 %v490_v51, %v1273_v57  ;;  %v493_v58 = vstv %s1395_s25  ;;  %v496_v10 = vstv %s1397_s26  ;;  %v499_v60 = vstv %s1403_s27  ;;  %s1513_s25 = sld [smem:[#allocation9 + $0xd]]  ;;  %s1515_s26 = sld [smem:[#allocation9 + $0xe]] }
  0x99   :  { %v494_v59 = vmul.f32 %v493_v58, %v1281_v30  ;;  %v502_v61 = vstv %s1405_s0  ;;  %v470_v62 = vadd.f32 %v469_v52, %v466_v41  ;;  %v497_v63 = vmul.f32 %v496_v10, %v1283_v47  ;;  %s1521_s27 = sld [smem:[#allocation10]]  ;;  %s1525_s0 = sld [smem:[#allocation10 + $0x1]] }
  0x9a   :  { %v500_v7 = vmul.f32 %v499_v60, %v1291_v6  ;;  %v503_v8 = vmul.f32 %v502_v61, %v1318_v22  ;;  %v504_v9 = vadd.f32 %v479_v44, %v476_v1  ;;  %v505_v11 = vadd.f32 %v485_v2, %v482_v49 }
  0x9b   :  { %v506_v12 = vadd.f32 %v491_v56, %v488_v53  ;;  %v514_v13 = vstv %s1411_s28  ;;  %v473_v14 = vadd.f32 %v472_v39, %v470_v62  ;;  %v507_v15 = vadd.f32 %v497_v63, %v494_v59  ;;  %s805_s28 = sld [smem:[#allocation10 + $0x2]] }
  0x9c   :  { %v508_v16 = vadd.f32 %v503_v8, %v500_v7  ;;  %v517_v17 = vstv %s1417_s29  ;;  %v509_v18 = vadd.f32 %v505_v11, %v504_v9  ;;  %v520_v20 = vstv %s1421_s5 }
  0x9d   :  { %v518_v19 = vmul.f32 %v517_v17, %v1252_v3  ;;  %v523_v21 = vstv %s1423_s6  ;;  %v510_v23 = vadd.f32 %v507_v15, %v506_v12  ;;  %v521_v24 = vmul.f32 %v520_v20, %v1255_v4 }
  0x9e   :  { %v524_v25 = vmul.f32 %v523_v21, %v1262_v54  ;;  %v526_v26 = vstv %s1428_s30  ;;  %v529_v28 = vstv %s1430_s9  ;;  %v532_v29 = vstv %s1436_s10 }
  0x9f   :  { %v527_v27 = vmul.f32 %v526_v26, %v1265_v55  ;;  %v535_v3 = vstv %s1438_s11  ;;  %v511_v31 = vadd.f32 %v510_v23, %v509_v18  ;;  %v530_v32 = vmul.f32 %v529_v28, %v1270_v45 }
  0xa0   :  { %v533_v4 = vmul.f32 %v532_v29, %v1273_v57  ;;  %v536_v54 = vmul.f32 %v535_v3, %v1281_v30  ;;  %v538_v33 = vstv %s1443_s12  ;;  %v541_v34 = vstv %s1449_s13 }
  0xa1   :  { %v544_v35 = vstv %s1451_s2  ;;  %v546_v55 = vadd.f32 %v521_v24, %v518_v19  ;;  %v512_v36 = vadd.f32 %v511_v31, %v508_v16  ;;  %v539_v38 = vmul.f32 %v538_v33, %v1283_v47 }
  0xa2   :  { %v542_v39 = vmul.f32 %v541_v34, %v1291_v6  ;;  %v545_v45 = vmul.f32 %v544_v35, %v1318_v22  ;;  %v547_v57 = vadd.f32 %v527_v27, %v524_v25  ;;  %v548_v30 = vadd.f32 %v533_v4, %v530_v32 }
  0xa3   :  { %v558_v40 = vmul.f32 0.01, %v1372_v5  ;;  %v515_v41 = vadd.f32 %v514_v13, %v512_v36  ;;  %v549_v0 = vadd.f32 %v539_v38, %v536_v54  ;;  %v560_v47 = vmul.f32 0.01, %v1413_v37 }
  0xa4   :  { %v550_v1 = vadd.f32 %v545_v45, %v542_v39  ;;  %v551_v6 = vadd.f32 %v547_v57, %v546_v55  ;;  %v562_v42 = vmul.f32 0.01, %v473_v14  ;;  %v569_v43 = vstv %s1461_s4 }
  0xa5   :  { %v559_v22 = vmax.f32 %v1372_v5, %v558_v40  ;;  %v552_v44 = vadd.f32 %v549_v0, %v548_v30  ;;  %v561_v46 = vmax.f32 %v1413_v37, %v560_v47  ;;  %v564_v48 = vmul.f32 0.01, %v515_v41 }
  0xa6   :  { %v572_v49 = vstv %s1466_s14  ;;  %v563_v2 = vmax.f32 %v473_v14, %v562_v42  ;;  %v575_v5 = vstv %s1472_s15  ;;  %v578_v51 = vstv %s1474_s16 }
  0xa7   :  { %v570_v50 = vmul.f32 %v569_v43, %v559_v22  ;;  %v553_v52 = vadd.f32 %v552_v44, %v551_v6  ;;  %v565_v53 = vmax.f32 %v515_v41, %v564_v48  ;;  %v573_v56 = vmul.f32 %v572_v49, %v561_v46 }
  0xa8   :  { %v556_v37 = vstv %s1479_s17  ;;  %v576_v58 = vmul.f32 %v575_v5, %v563_v2  ;;  %v591_v59 = vstv %s1484_s18  ;;  %v594_v10 = vstv %s1486_s19 }
  0xa9   :  { %v554_v60 = vadd.f32 %v553_v52, %v550_v1  ;;  %v579_v61 = vmul.f32 %v578_v51, %v565_v53  ;;  %v583_v62 = vadd.f32 %v573_v56, %v570_v50  ;;  %v592_v63 = vmul.f32 %v591_v59, %v559_v22 }
  0xaa   :  { %v581_v7 = vstv %s1491_s20  ;;  %v595_v8 = vmul.f32 %v594_v10, %v561_v46  ;;  %v597_v9 = vstv %s1494_s21  ;;  %v600_v11 = vstv %s1496_s1 }
  0xab   :  { %v557_v12 = vadd.f32 %v556_v37, %v554_v60  ;;  %v584_v13 = vadd.f32 %v579_v61, %v576_v58  ;;  %v598_v14 = vmul.f32 %v597_v9, %v563_v2  ;;  %v601_v15 = vmul.f32 %v600_v11, %v565_v53 }
  0xac   :  { %v603_v16 = vstv %s1499_s3  ;;  %v605_v17 = vadd.f32 %v595_v8, %v592_v63  ;;  %v613_v18 = vstv %s1503_s22  ;;  %v616_v19 = vstv %s1505_s23 }
  0xad   :  { %v566_v20 = vmul.f32 0.01, %v557_v12  ;;  %v585_v21 = vadd.f32 %v584_v13, %v583_v62  ;;  %v606_v23 = vadd.f32 %v601_v15, %v598_v14  ;;  %v614_v24 = vmul.f32 %v613_v18, %v559_v22 }
  0xae   :  { %v617_v25 = vmul.f32 %v616_v19, %v561_v46  ;;  %v619_v26 = vstv %s1509_s24  ;;  %v622_v27 = vstv %s1513_s25  ;;  %v625_v28 = vstv %s1515_s26 }
  0xaf   :  { %v567_v29 = vmax.f32 %v557_v12, %v566_v20  ;;  %v607_v3 = vadd.f32 %v606_v23, %v605_v17  ;;  %v620_v31 = vmul.f32 %v619_v26, %v563_v2  ;;  %v623_v32 = vmul.f32 %v622_v27, %v565_v53 }
  0xb0   :  { %v627_v4 = vadd.f32 %v617_v25, %v614_v24  ;;  %v588_v55 = vstv %s1521_s27  ;;  %v610_v36 = vstv %s1525_s0  ;;  %v632_v57 = vstv %s805_s28 }
  0xb1   :  { %v582_v54 = vmul.f32 %v581_v7, %v567_v29  ;;  %v604_v33 = vmul.f32 %v603_v16, %v567_v29  ;;  %v626_v34 = vmul.f32 %v625_v28, %v567_v29  ;;  %v628_v35 = vadd.f32 %v623_v32, %v620_v31 }
  0xb2   :  { %v916_v6 = vmov 0  }
  0xb3   :  { %v586_v38 = vadd.f32 %v585_v21, %v582_v54  ;;  %v608_v39 = vadd.f32 %v607_v3, %v604_v33  ;;  %v629_v45 = vadd.f32 %v628_v35, %v627_v4 }
  0xb5   :  { %v589_v30 = vadd.f32 %v588_v55, %v586_v38  ;;  %v611_v40 = vadd.f32 %v610_v36, %v608_v39  ;;  %v630_v41 = vadd.f32 %v629_v45, %v626_v34 }
  0xb7   :  { %v633_v0 = vadd.f32 %v632_v57, %v630_v41  ;;  %v806_v1 = vmul.f32 -1.442695, %v589_v30  ;;  %v807_v47 = vmul.f32 -1.442695, %v611_v40  ;;  %vm657_vm0 = vcmp.gt.f32.partialorder %v611_v40, %v589_v30 }
  0xb8   :  { %v658_v22 = vsel %vm657_vm0, 1, %v916_v6  ;;  %v659_v42 = vmax.f32 %v589_v30, %v611_v40 }
  0xb9   :  { %818 = vpow2.f32 %v806_v1  ;;  %v809_v43 = vmul.f32 -1.442695, %v633_v0 }
  0xba   :  { %820 = vpow2.f32 %v807_v47  ;;  %vm660_vm1 = vcmp.gt.f32.partialorder %v633_v0, %v659_v42 }
  0xbb   :  { %822 = vpow2.f32 %v809_v43  ;;  %v661_v44 = vsel %vm660_vm1, 2, %v658_v22 }
  0xbc   :  { %662 = vst [vmem:[%s1554_s7] sm:$0x1] %v661_v44 }
  0xc3   :  { %v819_v46 = vpop.eup %818 }
  0xc4   :  { %v821_v48 = vpop.eup %820  ;;  %v637_v49 = vadd.f32 1.0, %v819_v46 }
  0xc5   :  { %v823_v2 = vpop.eup %822  ;;  %v644_v50 = vadd.f32 1.0, %v821_v48 }
  0xc6   :  { %824 = vrcp.f32 %v637_v49  ;;  %v652_v5 = vadd.f32 1.0, %v823_v2 }
  0xc7   :  { %826 = vrcp.f32 %v644_v50 }
  0xc8   :  { %828 = vrcp.f32 %v652_v5 }
  0xd0   :  { %v825_v51 = vpop.eup %824 }
  0xd1   :  { %v827_v52 = vpop.eup %826  ;;  %640 = vst [vmem:[%s1555_s8] sm:$0x1] %v825_v51 }
  0xd2   :  { %v829_v53 = vpop.eup %828  ;;  %808 = vst [vmem:[%s1555_s8 + $0x1] sm:$0x1] %v827_v52 }
  0xd3   :  { %810 = vst [vmem:[%s1555_s8 + $0x2] sm:$0x1] %v829_v53 }
  0xd4   :  { %671 = vsyncpa [#allocation3], 1 }
  0xd5   :  { %672 = vsyncpa [#allocation5], 1 }
  0xd6   :  { %673 = vsyncpa [#allocation8], 1 }
  0xd7   :  { %674 = vsyncpa [#allocation11], 1 }

</bundles_post_ra>
